<compile_context>
chip_gen: v7x
topology: tpu7x:2x2x1
jax: 0.10.0
libtpu: 0.0.40
codegen_flags: <defaults>
</compile_context>

<pallas_src>
import functools

import jax
import jax.numpy as jnp
from jax import lax
from jax.experimental import pallas as pl
from jax.experimental.pallas import tpu as pltpu


BN_EPS = 1e-5


def _bn_affine(x, gamma, beta, relu):
    """Training-mode BatchNorm1d over the batch axis (centered, biased var)."""
    n = x.shape[0]
    inv_n = 1.0 / float(n)
    mean = jnp.sum(x, axis=0, keepdims=True) * inv_n
    xc = x - mean
    var = jnp.sum(xc * xc, axis=0, keepdims=True) * inv_n    # biased variance
    scale = gamma * lax.rsqrt(var + BN_EPS)
    y = xc * scale + beta
    if relu:
        y = jnp.maximum(y, 0.0)
    return y


def _trunk(z2_ref, w1_ref, g1_ref, be1_ref, w2_ref, g2_ref, be2_ref):
    """Layers 1 & 2: Linear -> BN -> ReLU, twice.  Returns bf16 (B, H2)."""
    h = jnp.dot(z2_ref[...], w1_ref[...], preferred_element_type=jnp.float32)
    h = _bn_affine(h, g1_ref[...], be1_ref[...], relu=True)
    h = jnp.dot(h.astype(jnp.bfloat16), w2_ref[...],
                preferred_element_type=jnp.float32)
    h = _bn_affine(h, g2_ref[...], be2_ref[...], relu=True)
    return h.astype(jnp.bfloat16)


# --------------------------------------------------------------------------
# Single-shot kernel (nt == 1): everything in one invocation, direct softmax.
# --------------------------------------------------------------------------
def xdecoder_single_kernel(z2_ref, w1_ref, g1_ref, be1_ref,
                           w2_ref, g2_ref, be2_ref,
                           w3_ref, g3_ref, be3_ref,
                           gate_ref, mu_ref, *, G):
    h2 = _trunk(z2_ref, w1_ref, g1_ref, be1_ref, w2_ref, g2_ref, be2_ref)
    h3 = jnp.dot(h2, w3_ref[...], preferred_element_type=jnp.float32)
    h3 = _bn_affine(h3, g3_ref[...], be3_ref[...], relu=False)
    gate = h3[:, :G]
    mulog = h3[:, G:]
    gate_ref[...] = gate.astype(gate_ref.dtype)
    m = jnp.max(mulog, axis=-1, keepdims=True)
    e = jnp.exp(mulog - m)
    mu_ref[...] = (e / jnp.sum(e, axis=-1, keepdims=True)).astype(mu_ref.dtype)


# --------------------------------------------------------------------------
# Tiled kernel (nt > 1): grid = (2 * nt,).
#   Phase 1 (j <  nt): layer 3 on feature tile j, write gate tile, keep mu
#                      BN logits resident in VMEM, stream (max, sum-exp).
#   Phase 2 (j >= nt): write mu tile = exp(resident logits - logsumexp).
# --------------------------------------------------------------------------
def xdecoder_tiled_kernel(z2_ref, w1_ref, g1_ref, be1_ref,
                          w2_ref, g2_ref, be2_ref,
                          w3_ref, g3_ref, be3_ref,
                          gate_ref, mu_ref,
                          h2_scr, logit_scr, m_scr, l_scr,
                          *, nt, tile_n):
    j = pl.program_id(0)

    @pl.when(j == 0)
    def _():
        h2_scr[...] = _trunk(z2_ref, w1_ref, g1_ref, be1_ref,
                             w2_ref, g2_ref, be2_ref)
        m_scr[...] = jnp.full(m_scr.shape, -jnp.inf, m_scr.dtype)
        l_scr[...] = jnp.zeros(l_scr.shape, l_scr.dtype)

    @pl.when(j < nt)
    def _():
        # One wide MXU push per step: (B, H2) x (H2, 2*tile_n); the weight
        # tile holds [gate_tile | mu_tile] interleaved by the wrapper.
        h3 = jnp.dot(h2_scr[...], w3_ref[...],
                     preferred_element_type=jnp.float32)
        h3 = _bn_affine(h3, g3_ref[...], be3_ref[...], relu=False)
        gate = h3[:, :tile_n]
        mu = h3[:, tile_n:]
        gate_ref[...] = gate.astype(gate_ref.dtype)
        logit_scr[j] = mu.astype(logit_scr.dtype)     # resident, no HBM trip
        # Streaming log-sum-exp over the feature tiles.
        m_prev = m_scr[...]
        m_new = jnp.maximum(m_prev, jnp.max(mu, axis=-1, keepdims=True))
        l_scr[...] = (l_scr[...] * jnp.exp(m_prev - m_new)
                      + jnp.sum(jnp.exp(mu - m_new), axis=-1, keepdims=True))
        m_scr[...] = m_new

    @pl.when(j >= nt)
    def _():
        logz = m_scr[...] + jnp.log(l_scr[...])
        logit = logit_scr[j - nt].astype(jnp.float32)
        mu_ref[...] = jnp.exp(logit - logz).astype(mu_ref.dtype)


def _spec(shape, index_map, buffers=None):
    """BlockSpec, optionally requesting deeper pipelining when available."""
    if buffers is not None and hasattr(pl, "Buffered"):
        try:
            return pl.BlockSpec(shape, index_map,
                                pipeline_mode=pl.Buffered(buffers))
        except Exception:  # pipeline_mode unsupported in this jax version
            pass
    return pl.BlockSpec(shape, index_map)


def xdecoder_forward(z2, params, num_genes, *, tile_n=None,
                     out_dtype=jnp.float32):
    """params = [(w, b, gamma, beta)] * 3, weights stored (in, out), f32.

    Linear biases b are accepted but unused: they are exactly cancelled by the
    batch-mean subtraction of training-mode BatchNorm."""
    B, Z = z2.shape
    (w1, _b1, g1, be1), (w2, _b2, g2, be2), (w3, _b3, g3, be3) = params
    H1 = w1.shape[1]
    H2 = w2.shape[1]
    G = num_genes
    assert w3.shape == (H2, 2 * G)

    # TODO(synk): zero-pad (and -inf mask the padded mu columns) to support
    # feature dims that are not multiples of 128.
    for d in (Z, H1, H2, G):
        assert d % 128 == 0, "feature dims must be multiples of 128"

    if tile_n is None:
        if G <= 2048:
            tile_n = G                      # single-shot fast path
        else:
            tile_n = next(t for t in (2048, 1024, 512, 256, 128) if G % t == 0)
    assert G % tile_n == 0 and tile_n % 128 == 0
    nt = G // tile_n

    bf = jnp.bfloat16
    z2b = z2.astype(bf)
    w1b = w1.astype(bf)
    w2b = w2.astype(bf)

    # Interleave gate/mu columns per feature tile: tile j of the packed weight
    # holds [W3_gate_tile_j | W3_mu_tile_j].  Per-feature BN -> splitting /
    # reordering columns is numerically identical.
    def interleave(m):
        a = m[:, :G].reshape(m.shape[0], nt, tile_n)
        b = m[:, G:].reshape(m.shape[0], nt, tile_n)
        return jnp.concatenate([a, b], axis=-1).reshape(m.shape[0], 2 * G)

    w3c = interleave(w3).astype(bf)
    g3c = interleave(g3)
    be3c = interleave(be3)

    out_shape = (jax.ShapeDtypeStruct((B, G), out_dtype),
                 jax.ShapeDtypeStruct((B, G), out_dtype))
    out_isz = jnp.dtype(out_dtype).itemsize

    # ---------------------------- fast path ------------------------------
    if nt == 1:
        def const1(shape):
            return pl.BlockSpec(shape, lambda i: (0, 0))

        vmem_needed = (2 * (B * Z + Z * H1 + H1 * H2 + H2 * 2 * G) * 2
                       + 2 * 2 * B * G * out_isz + 4 * B * 2 * G * 4
                       + (1 << 20))
        vmem_limit = int(min(max(vmem_needed, 32 << 20), 64 << 20))

        gate, mu = pl.pallas_call(
            functools.partial(xdecoder_single_kernel, G=G),
            out_shape=out_shape,
            grid_spec=pltpu.PrefetchScalarGridSpec(
                num_scalar_prefetch=0,
                grid=(1,),
                in_specs=[const1((B, Z)),
                          const1((Z, H1)), const1((1, H1)), const1((1, H1)),
                          const1((H1, H2)), const1((1, H2)), const1((1, H2)),
                          const1((H2, 2 * G)), const1((1, 2 * G)),
                          const1((1, 2 * G))],
                out_specs=(pl.BlockSpec((B, G), lambda i: (0, 0)),
                           pl.BlockSpec((B, G), lambda i: (0, 0)))),
            compiler_params=pltpu.CompilerParams(
                dimension_semantics=("arbitrary",),
                vmem_limit_bytes=vmem_limit),
        )(z2b, w1b, g1, be1, w2b, g2, be2, w3c, g3c, be3c)
        return gate, mu

    # ---------------------------- tiled path ------------------------------
    # Resident mu-logits scratch: f32 unless it gets large, then bf16.
    scr_dtype = jnp.float32 if B * G * 4 <= (24 << 20) else bf
    scr_isz = jnp.dtype(scr_dtype).itemsize

    last = nt - 1

    def const(shape):
        return pl.BlockSpec(shape, lambda j: (0, 0))

    def held(shape, buffers=None):
        # Streamed during phase 1, held on the last tile during phase 2
        # (no re-fetch once the block index stops changing).
        return _spec(shape, lambda j: (0, jnp.minimum(j, last)), buffers)

    in_specs = [
        const((B, Z)),                                       # z2
        const((Z, H1)), const((1, H1)), const((1, H1)),      # w1, g1, be1
        const((H1, H2)), const((1, H2)), const((1, H2)),     # w2, g2, be2
        held((H2, 2 * tile_n), buffers=3),                   # w3 (gate|mu tile)
        held((1, 2 * tile_n)), held((1, 2 * tile_n)),        # g3, be3
    ]
    out_specs = (
        # gate: written tile-by-tile during phase 1, held during phase 2
        pl.BlockSpec((B, tile_n), lambda j: (0, jnp.minimum(j, last))),
        # mu: held (unwritten) during phase 1, written tile-by-tile in phase 2
        pl.BlockSpec((B, tile_n), lambda j: (0, jnp.where(j < nt, 0, j - nt))),
    )
    scratch = [
        pltpu.VMEM((B, H2), bf),              # trunk activation h2 (resident)
        pltpu.VMEM((nt, B, tile_n), scr_dtype),  # resident mu BN logits
        pltpu.VMEM((B, 1), jnp.float32),      # running max
        pltpu.VMEM((B, 1), jnp.float32),      # running sum of exp
    ]

    vmem_needed = (
        B * G * scr_isz                              # resident logits
        + B * H2 * 2                                 # h2 scratch
        + 3 * H2 * (2 * tile_n) * 2                  # W3 tiles (<=3 buffers)
        + 2 * 2 * B * tile_n * out_isz               # gate/mu out tiles x2buf
        + 2 * (B * Z + Z * H1 + H1 * H2) * 2         # const bf16 inputs x2buf
        + 8 * (2 * G) * 4                            # gamma/beta tiles + misc
        + (1 << 20)                                  # slack
    )
    vmem_limit = int(min(max(vmem_needed, 32 << 20), 64 << 20))

    gate, mu = pl.pallas_call(
        functools.partial(xdecoder_tiled_kernel, nt=nt, tile_n=tile_n),
        out_shape=out_shape,
        grid_spec=pltpu.PrefetchScalarGridSpec(
            num_scalar_prefetch=0,
            grid=(2 * nt,),
            in_specs=in_specs,
            out_specs=out_specs,
            scratch_shapes=scratch),
        # The single grid axis carries the resident scratch / LSE state.
        compiler_params=pltpu.CompilerParams(
            dimension_semantics=("arbitrary",),
            vmem_limit_bytes=vmem_limit),
    )(z2b, w1b, g1, be1, w2b, g2, be2, w3c, g3c, be3c)

    return gate, mu


def init_params(key, z2_dim, hidden_dims, num_genes):
    """Deterministic synthetic params.  Linear weights stored as (in, out)."""
    dims = [z2_dim] + list(hidden_dims) + [2 * num_genes]
    params = []
    for d_in, d_out in zip(dims, dims[1:]):
        key, kw, kb, kg, ke = jax.random.split(key, 5)
        bound = float(d_in) ** -0.5
        w = jax.random.uniform(kw, (d_in, d_out), jnp.float32, -bound, bound)
        b = jax.random.uniform(kb, (1, d_out), jnp.float32, -bound, bound)
        gamma = 1.0 + 0.1 * jax.random.uniform(kg, (1, d_out), jnp.float32,
                                               -1.0, 1.0)
        beta = 0.1 * jax.random.normal(ke, (1, d_out), jnp.float32)
        params.append((w, b, gamma, beta))
    return params


def reference_forward(z2, params, num_genes, matmul_dtype=jnp.float32):
    """Pure-JAX reference mirroring the PyTorch module (biases included)."""
    h = z2
    n_layers = len(params)
    for i, (w, b, g, be) in enumerate(params):
        h = jnp.dot(h.astype(matmul_dtype), w.astype(matmul_dtype),
                    preferred_element_type=jnp.float32) + b
        mean = jnp.mean(h, axis=0, keepdims=True)
        var = jnp.mean((h - mean) ** 2, axis=0, keepdims=True)
        h = g * (h - mean) / jnp.sqrt(var + BN_EPS) + be
        if i < n_layers - 1:
            h = jnp.maximum(h, 0.0)
    gate_logits = h[:, :num_genes]
    mu = jax.nn.softmax(h[:, num_genes:], axis=-1)
    return gate_logits, mu


if __name__ == "__main__":
    # Small, lane-aligned shapes (multiples of 128).
    B, z2_dim, hidden_dims, num_genes = 128, 128, [128, 128], 256

    key = jax.random.PRNGKey(0)
    key, kz = jax.random.split(key)
    z2 = jax.random.normal(kz, (B, z2_dim), jnp.float32)
    params = init_params(key, z2_dim, hidden_dims, num_genes)

    # Reference matched to the kernel's bf16 matmul operands (tight check) and
    # the module-faithful f32 reference (loose check, bf16 operand rounding).
    ref_gate_m, ref_mu_m = reference_forward(z2, params, num_genes,
                                             matmul_dtype=jnp.bfloat16)
    ref_gate_f, ref_mu_f = reference_forward(z2, params, num_genes,
                                             matmul_dtype=jnp.float32)

    # tile_n=None -> single-shot fast path; tile_n=128 -> streaming tiled path.
    for tn in (None, 128):
        gate_logits, mu = jax.block_until_ready(
            xdecoder_forward(z2, params, num_genes, tile_n=tn))

        assert gate_logits.shape == (B, num_genes) and mu.shape == (B, num_genes)
        assert bool(jnp.all(jnp.isfinite(gate_logits)))
        assert bool(jnp.all(jnp.isfinite(mu)))
        assert jnp.allclose(gate_logits, ref_gate_m, atol=2e-3, rtol=2e-3)
        assert jnp.allclose(mu, ref_mu_m, atol=1e-5, rtol=1e-2)
        assert jnp.allclose(gate_logits, ref_gate_f, atol=1e-1, rtol=1e-1)
        assert jnp.allclose(mu, ref_mu_f, atol=5e-3, rtol=1e-1)
        assert jnp.allclose(jnp.sum(mu, axis=-1), 1.0, atol=1e-4)

    print("KERNEL_OK")
</pallas_src>

<mosaic_0001>
module attributes {stable_mosaic.version = 11 : i64} {
  func.func @xdecoder_single_kernel(%arg0: i32, %arg1: memref<128x128xbf16, #tpu.memory_space<vmem>>, %arg2: memref<128x128xbf16, #tpu.memory_space<vmem>>, %arg3: memref<1x128xf32, #tpu.memory_space<vmem>>, %arg4: memref<1x128xf32, #tpu.memory_space<vmem>>, %arg5: memref<128x128xbf16, #tpu.memory_space<vmem>>, %arg6: memref<1x128xf32, #tpu.memory_space<vmem>>, %arg7: memref<1x128xf32, #tpu.memory_space<vmem>>, %arg8: memref<128x512xbf16, #tpu.memory_space<vmem>>, %arg9: memref<1x512xf32, #tpu.memory_space<vmem>>, %arg10: memref<1x512xf32, #tpu.memory_space<vmem>>, %arg11: memref<128x256xf32, #tpu.memory_space<vmem>>, %arg12: memref<128x256xf32, #tpu.memory_space<vmem>>) attributes {dimension_semantics = [#tpu.dimension_semantics<arbitrary>], iteration_bounds = array<i64: 1>, scalar_prefetch = 0 : i64, scratch_operands = 0 : i64, tpu.core_type = #tpu.core_type<tc>, window_params = [{pipeline_mode = #tpu.pipeline_mode<synchronous>, transform_indices = @transform_0, window_bounds = array<i64: 128, 128>}, {pipeline_mode = #tpu.pipeline_mode<synchronous>, transform_indices = @transform_1, window_bounds = array<i64: 128, 128>}, {pipeline_mode = #tpu.pipeline_mode<synchronous>, transform_indices = @transform_2, window_bounds = array<i64: 1, 128>}, {pipeline_mode = #tpu.pipeline_mode<synchronous>, transform_indices = @transform_3, window_bounds = array<i64: 1, 128>}, {pipeline_mode = #tpu.pipeline_mode<synchronous>, transform_indices = @transform_4, window_bounds = array<i64: 128, 128>}, {pipeline_mode = #tpu.pipeline_mode<synchronous>, transform_indices = @transform_5, window_bounds = array<i64: 1, 128>}, {pipeline_mode = #tpu.pipeline_mode<synchronous>, transform_indices = @transform_6, window_bounds = array<i64: 1, 128>}, {pipeline_mode = #tpu.pipeline_mode<synchronous>, transform_indices = @transform_7, window_bounds = array<i64: 128, 512>}, {pipeline_mode = #tpu.pipeline_mode<synchronous>, transform_indices = @transform_8, window_bounds = array<i64: 1, 512>}, {pipeline_mode = #tpu.pipeline_mode<synchronous>, transform_indices = @transform_9, window_bounds = array<i64: 1, 512>}, {pipeline_mode = #tpu.pipeline_mode<synchronous>, transform_indices = @transform_10, window_bounds = array<i64: 128, 256>}, {pipeline_mode = #tpu.pipeline_mode<synchronous>, transform_indices = @transform_11, window_bounds = array<i64: 128, 256>}]} {
    %c0 = arith.constant 0 : index
    %c0_0 = arith.constant 0 : index
    %0 = vector.load %arg1[%c0, %c0_0] : memref<128x128xbf16, #tpu.memory_space<vmem>>, vector<128x128xbf16>
    %c0_1 = arith.constant 0 : index
    %c0_2 = arith.constant 0 : index
    %1 = vector.load %arg2[%c0_1, %c0_2] : memref<128x128xbf16, #tpu.memory_space<vmem>>, vector<128x128xbf16>
    %cst = arith.constant dense<0.000000e+00> : vector<128x128xf32>
    %2 = tpu.matmul %0, %1, %cst {dimension_numbers = #tpu.dot_dimension_numbers<[1], [0], [0], [1], [0, 0, 1, 1], [], []>} : vector<128x128xbf16>, vector<128x128xbf16>, vector<128x128xf32> -> vector<128x128xf32>
    %c0_3 = arith.constant 0 : index
    %c0_4 = arith.constant 0 : index
    %3 = vector.load %arg3[%c0_3, %c0_4] : memref<1x128xf32, #tpu.memory_space<vmem>>, vector<1x128xf32>
    %c0_5 = arith.constant 0 : index
    %c0_6 = arith.constant 0 : index
    %4 = vector.load %arg4[%c0_5, %c0_6] : memref<1x128xf32, #tpu.memory_space<vmem>>, vector<1x128xf32>
    %cst_7 = arith.constant dense<0.000000e+00> : vector<128xf32>
    %5 = vector.multi_reduction <add>, %2, %cst_7 [0] : vector<128x128xf32> to vector<128xf32>
    %6 = vector.shape_cast %5 : vector<128xf32> to vector<1x128xf32>
    %cst_8 = arith.constant 7.812500e-03 : f32
    %7 = vector.broadcast %cst_8 : f32 to vector<1x128xf32>
    %8 = arith.mulf %6, %7 : vector<1x128xf32>
    %9 = vector.broadcast %8 : vector<1x128xf32> to vector<128x128xf32>
    %10 = arith.subf %2, %9 : vector<128x128xf32>
    %11 = arith.mulf %10, %10 : vector<128x128xf32>
    %cst_9 = arith.constant dense<0.000000e+00> : vector<128xf32>
    %12 = vector.multi_reduction <add>, %11, %cst_9 [0] : vector<128x128xf32> to vector<128xf32>
    %13 = vector.shape_cast %12 : vector<128xf32> to vector<1x128xf32>
    %cst_10 = arith.constant 7.812500e-03 : f32
    %14 = vector.broadcast %cst_10 : f32 to vector<1x128xf32>
    %15 = arith.mulf %13, %14 : vector<1x128xf32>
    %cst_11 = arith.constant 9.99999974E-6 : f32
    %16 = vector.broadcast %cst_11 : f32 to vector<1x128xf32>
    %17 = arith.addf %15, %16 : vector<1x128xf32>
    %18 = math.rsqrt %17 : vector<1x128xf32>
    %19 = arith.mulf %3, %18 : vector<1x128xf32>
    %20 = vector.broadcast %19 : vector<1x128xf32> to vector<128x128xf32>
    %21 = arith.mulf %10, %20 : vector<128x128xf32>
    %22 = vector.broadcast %4 : vector<1x128xf32> to vector<128x128xf32>
    %23 = arith.addf %21, %22 : vector<128x128xf32>
    %cst_12 = arith.constant 0.000000e+00 : f32
    %24 = vector.broadcast %cst_12 : f32 to vector<128x128xf32>
    %25 = arith.maximumf %23, %24 : vector<128x128xf32>
    %26 = arith.truncf %25 : vector<128x128xf32> to vector<128x128xbf16>
    %c0_13 = arith.constant 0 : index
    %c0_14 = arith.constant 0 : index
    %27 = vector.load %arg5[%c0_13, %c0_14] : memref<128x128xbf16, #tpu.memory_space<vmem>>, vector<128x128xbf16>
    %cst_15 = arith.constant dense<0.000000e+00> : vector<128x128xf32>
    %28 = tpu.matmul %26, %27, %cst_15 {dimension_numbers = #tpu.dot_dimension_numbers<[1], [0], [0], [1], [0, 0, 1, 1], [], []>} : vector<128x128xbf16>, vector<128x128xbf16>, vector<128x128xf32> -> vector<128x128xf32>
    %c0_16 = arith.constant 0 : index
    %c0_17 = arith.constant 0 : index
    %29 = vector.load %arg6[%c0_16, %c0_17] : memref<1x128xf32, #tpu.memory_space<vmem>>, vector<1x128xf32>
    %c0_18 = arith.constant 0 : index
    %c0_19 = arith.constant 0 : index
    %30 = vector.load %arg7[%c0_18, %c0_19] : memref<1x128xf32, #tpu.memory_space<vmem>>, vector<1x128xf32>
    %cst_20 = arith.constant dense<0.000000e+00> : vector<128xf32>
    %31 = vector.multi_reduction <add>, %28, %cst_20 [0] : vector<128x128xf32> to vector<128xf32>
    %32 = vector.shape_cast %31 : vector<128xf32> to vector<1x128xf32>
    %cst_21 = arith.constant 7.812500e-03 : f32
    %33 = vector.broadcast %cst_21 : f32 to vector<1x128xf32>
    %34 = arith.mulf %32, %33 : vector<1x128xf32>
    %35 = vector.broadcast %34 : vector<1x128xf32> to vector<128x128xf32>
    %36 = arith.subf %28, %35 : vector<128x128xf32>
    %37 = arith.mulf %36, %36 : vector<128x128xf32>
    %cst_22 = arith.constant dense<0.000000e+00> : vector<128xf32>
    %38 = vector.multi_reduction <add>, %37, %cst_22 [0] : vector<128x128xf32> to vector<128xf32>
    %39 = vector.shape_cast %38 : vector<128xf32> to vector<1x128xf32>
    %cst_23 = arith.constant 7.812500e-03 : f32
    %40 = vector.broadcast %cst_23 : f32 to vector<1x128xf32>
    %41 = arith.mulf %39, %40 : vector<1x128xf32>
    %cst_24 = arith.constant 9.99999974E-6 : f32
    %42 = vector.broadcast %cst_24 : f32 to vector<1x128xf32>
    %43 = arith.addf %41, %42 : vector<1x128xf32>
    %44 = math.rsqrt %43 : vector<1x128xf32>
    %45 = arith.mulf %29, %44 : vector<1x128xf32>
    %46 = vector.broadcast %45 : vector<1x128xf32> to vector<128x128xf32>
    %47 = arith.mulf %36, %46 : vector<128x128xf32>
    %48 = vector.broadcast %30 : vector<1x128xf32> to vector<128x128xf32>
    %49 = arith.addf %47, %48 : vector<128x128xf32>
    %cst_25 = arith.constant 0.000000e+00 : f32
    %50 = vector.broadcast %cst_25 : f32 to vector<128x128xf32>
    %51 = arith.maximumf %49, %50 : vector<128x128xf32>
    %52 = arith.truncf %51 : vector<128x128xf32> to vector<128x128xbf16>
    %c0_26 = arith.constant 0 : index
    %c0_27 = arith.constant 0 : index
    %53 = vector.load %arg8[%c0_26, %c0_27] : memref<128x512xbf16, #tpu.memory_space<vmem>>, vector<128x512xbf16>
    %cst_28 = arith.constant dense<0.000000e+00> : vector<128x512xf32>
    %54 = tpu.matmul %52, %53, %cst_28 {dimension_numbers = #tpu.dot_dimension_numbers<[1], [0], [0], [1], [0, 0, 1, 1], [], []>} : vector<128x128xbf16>, vector<128x512xbf16>, vector<128x512xf32> -> vector<128x512xf32>
    %c0_29 = arith.constant 0 : index
    %c0_30 = arith.constant 0 : index
    %55 = vector.load %arg9[%c0_29, %c0_30] : memref<1x512xf32, #tpu.memory_space<vmem>>, vector<1x512xf32>
    %c0_31 = arith.constant 0 : index
    %c0_32 = arith.constant 0 : index
    %56 = vector.load %arg10[%c0_31, %c0_32] : memref<1x512xf32, #tpu.memory_space<vmem>>, vector<1x512xf32>
    %cst_33 = arith.constant dense<0.000000e+00> : vector<512xf32>
    %57 = vector.multi_reduction <add>, %54, %cst_33 [0] : vector<128x512xf32> to vector<512xf32>
    %58 = vector.shape_cast %57 : vector<512xf32> to vector<1x512xf32>
    %cst_34 = arith.constant 7.812500e-03 : f32
    %59 = vector.broadcast %cst_34 : f32 to vector<1x512xf32>
    %60 = arith.mulf %58, %59 : vector<1x512xf32>
    %61 = vector.broadcast %60 : vector<1x512xf32> to vector<128x512xf32>
    %62 = arith.subf %54, %61 : vector<128x512xf32>
    %63 = arith.mulf %62, %62 : vector<128x512xf32>
    %cst_35 = arith.constant dense<0.000000e+00> : vector<512xf32>
    %64 = vector.multi_reduction <add>, %63, %cst_35 [0] : vector<128x512xf32> to vector<512xf32>
    %65 = vector.shape_cast %64 : vector<512xf32> to vector<1x512xf32>
    %cst_36 = arith.constant 7.812500e-03 : f32
    %66 = vector.broadcast %cst_36 : f32 to vector<1x512xf32>
    %67 = arith.mulf %65, %66 : vector<1x512xf32>
    %cst_37 = arith.constant 9.99999974E-6 : f32
    %68 = vector.broadcast %cst_37 : f32 to vector<1x512xf32>
    %69 = arith.addf %67, %68 : vector<1x512xf32>
    %70 = math.rsqrt %69 : vector<1x512xf32>
    %71 = arith.mulf %55, %70 : vector<1x512xf32>
    %72 = vector.broadcast %71 : vector<1x512xf32> to vector<128x512xf32>
    %73 = arith.mulf %62, %72 : vector<128x512xf32>
    %74 = vector.broadcast %56 : vector<1x512xf32> to vector<128x512xf32>
    %75 = arith.addf %73, %74 : vector<128x512xf32>
    %76 = vector.extract_strided_slice %75 {offsets = [0, 0], sizes = [128, 256], strides = [1, 1]} : vector<128x512xf32> to vector<128x256xf32>
    %77 = vector.extract_strided_slice %75 {offsets = [0, 256], sizes = [128, 256], strides = [1, 1]} : vector<128x512xf32> to vector<128x256xf32>
    %c0_38 = arith.constant 0 : index
    %c0_39 = arith.constant 0 : index
    %78 = vector.load %arg11[%c0_38, %c0_39] : memref<128x256xf32, #tpu.memory_space<vmem>>, vector<128x256xf32>
    tpu.vector_store %arg11[%c0_38, %c0_39], %76 {strides = array<i32>} : memref<128x256xf32, #tpu.memory_space<vmem>>, vector<128x256xf32>,
    %cst_40 = arith.constant dense<0xFF800000> : vector<128xf32>
    %79 = vector.multi_reduction <maximumf>, %77, %cst_40 [1] : vector<128x256xf32> to vector<128xf32>
    %80 = vector.shape_cast %79 : vector<128xf32> to vector<128x1xf32>
    %81 = vector.broadcast %80 : vector<128x1xf32> to vector<128x256xf32>
    %82 = arith.subf %77, %81 : vector<128x256xf32>
    %83 = math.exp %82 : vector<128x256xf32>
    %cst_41 = arith.constant dense<0.000000e+00> : vector<128xf32>
    %84 = vector.multi_reduction <add>, %83, %cst_41 [1] : vector<128x256xf32> to vector<128xf32>
    %85 = vector.shape_cast %84 : vector<128xf32> to vector<128x1xf32>
    %86 = vector.broadcast %85 : vector<128x1xf32> to vector<128x256xf32>
    %87 = arith.divf %83, %86 : vector<128x256xf32>
    %c0_42 = arith.constant 0 : index
    %c0_43 = arith.constant 0 : index
    %88 = vector.load %arg12[%c0_42, %c0_43] : memref<128x256xf32, #tpu.memory_space<vmem>>, vector<128x256xf32>
    tpu.vector_store %arg12[%c0_42, %c0_43], %87 {strides = array<i32>} : memref<128x256xf32, #tpu.memory_space<vmem>>, vector<128x256xf32>,
    return
  }
  func.func @transform_0(%arg0: i32) -> (i32, i32) {
    %c0_i32 = arith.constant 0 : i32
    %c0_i32_0 = arith.constant 0 : i32
    %c0_i32_1 = arith.constant 0 : i32
    return %c0_i32, %c0_i32_0 : i32, i32
  }
  func.func @transform_1(%arg0: i32) -> (i32, i32) {
    %c0_i32 = arith.constant 0 : i32
    %c0_i32_0 = arith.constant 0 : i32
    %c0_i32_1 = arith.constant 0 : i32
    return %c0_i32, %c0_i32_0 : i32, i32
  }
  func.func @transform_2(%arg0: i32) -> (i32, i32) {
    %c0_i32 = arith.constant 0 : i32
    %c0_i32_0 = arith.constant 0 : i32
    %c0_i32_1 = arith.constant 0 : i32
    return %c0_i32, %c0_i32_0 : i32, i32
  }
  func.func @transform_3(%arg0: i32) -> (i32, i32) {
    %c0_i32 = arith.constant 0 : i32
    %c0_i32_0 = arith.constant 0 : i32
    %c0_i32_1 = arith.constant 0 : i32
    return %c0_i32, %c0_i32_0 : i32, i32
  }
  func.func @transform_4(%arg0: i32) -> (i32, i32) {
    %c0_i32 = arith.constant 0 : i32
    %c0_i32_0 = arith.constant 0 : i32
    %c0_i32_1 = arith.constant 0 : i32
    return %c0_i32, %c0_i32_0 : i32, i32
  }
  func.func @transform_5(%arg0: i32) -> (i32, i32) {
    %c0_i32 = arith.constant 0 : i32
    %c0_i32_0 = arith.constant 0 : i32
    %c0_i32_1 = arith.constant 0 : i32
    return %c0_i32, %c0_i32_0 : i32, i32
  }
  func.func @transform_6(%arg0: i32) -> (i32, i32) {
    %c0_i32 = arith.constant 0 : i32
    %c0_i32_0 = arith.constant 0 : i32
    %c0_i32_1 = arith.constant 0 : i32
    return %c0_i32, %c0_i32_0 : i32, i32
  }
  func.func @transform_7(%arg0: i32) -> (i32, i32) {
    %c0_i32 = arith.constant 0 : i32
    %c0_i32_0 = arith.constant 0 : i32
    %c0_i32_1 = arith.constant 0 : i32
    return %c0_i32, %c0_i32_0 : i32, i32
  }
  func.func @transform_8(%arg0: i32) -> (i32, i32) {
    %c0_i32 = arith.constant 0 : i32
    %c0_i32_0 = arith.constant 0 : i32
    %c0_i32_1 = arith.constant 0 : i32
    return %c0_i32, %c0_i32_0 : i32, i32
  }
  func.func @transform_9(%arg0: i32) -> (i32, i32) {
    %c0_i32 = arith.constant 0 : i32
    %c0_i32_0 = arith.constant 0 : i32
    %c0_i32_1 = arith.constant 0 : i32
    return %c0_i32, %c0_i32_0 : i32, i32
  }
  func.func @transform_10(%arg0: i32) -> (i32, i32) {
    %c0_i32 = arith.constant 0 : i32
    %c0_i32_0 = arith.constant 0 : i32
    %c0_i32_1 = arith.constant 0 : i32
    return %c0_i32, %c0_i32_0 : i32, i32
  }
  func.func @transform_11(%arg0: i32) -> (i32, i32) {
    %c0_i32 = arith.constant 0 : i32
    %c0_i32_0 = arith.constant 0 : i32
    %c0_i32_1 = arith.constant 0 : i32
    return %c0_i32, %c0_i32_0 : i32, i32
  }
}

</mosaic_0001>

<bundles_post_ra>
// kernel: tpu_custom_call.1
= control target key start
LH: loop header
LB: loop body
LE: loop exit
PB: predicated region body
PF: predicated region fallthrough
CT: control target
= control target key end

     0   :  { %17 = vsyncpa [#allocation3], 0  ;;  %s3883_s0 = inlined_call_operand.hbm [shape: bf16[128,128], index: 0, kind: input, shape index: {}]   ;;  %s3884_s1 = inlined_call_operand.hbm [shape: bf16[128,128], index: 1, kind: input, shape index: {}]   ;;  %s3885_s2 = inlined_call_operand.vmem [shape: f32[1,128], index: 2, kind: input, shape index: {}]   ;;  %s3886_s3 = inlined_call_operand.vmem [shape: f32[1,128], index: 3, kind: input, shape index: {}]   ;;  %s3887_s4 = inlined_call_operand.hbm [shape: bf16[128,128], index: 4, kind: input, shape index: {}]   ;;  %s3888_s5 = inlined_call_operand.vmem [shape: f32[1,128], index: 5, kind: input, shape index: {}]   ;;  %s3889_s6 = inlined_call_operand.vmem [shape: f32[1,128], index: 6, kind: input, shape index: {}]   ;;  %s3890_s7 = inlined_call_operand.hbm [shape: bf16[128,512], index: 7, kind: input, shape index: {}]   ;;  %s3891_s8 = inlined_call_operand.vmem [shape: f32[1,512], index: 8, kind: input, shape index: {}]   ;;  %s3892_s9 = inlined_call_operand.vmem [shape: f32[1,512], index: 9, kind: input, shape index: {}]   ;;  %s3893_s10 = inlined_call_operand.hbm [shape: f32[128,256], index: 10, kind: output, shape index: {0}]   ;;  %s3894_s11 = inlined_call_operand.hbm [shape: f32[128,256], index: 11, kind: output, shape index: {1}]  }
   0x1   :  { %18 = vsyncpa [#allocation6], 0 }
   0x2   :  { %19 = vsyncpa [#allocation9], 0 }
   0x3   :  { %20 = vsyncpa [#allocation4], 0 }
   0x4   :  { %21 = vsyncpa [#allocation12], 0  ;;  %s2538_s17 = smov [#allocation5]   ;;  %s2539_s19 = smov [#allocation2]  }
   0x5   :  { %s39_s18 = sshll.u32 %s2538_s17, 4  ;;  %s27_s20 = sshll.u32 %s2539_s19, 4  ;;  %s40_s18 = int_to_ptr.vmem [resolvable:$true] %s39_s18  ;;  %s2610_s20 = int_to_ptr.vmem [resolvable:$true] %s27_s20 }
   0x6   :  { %s2396_s23 = scalar_lea.hbm %s3884_s1, 1024 }
   0x7   :  { %p2397_p0 = scmp.ne.s32.totalorder %s3884_s1, %s2396_s23  ;;  %p2400_p1 = scmp.lt.u32.totalorder %s2396_s23, %s3884_s1 }
   0x9   :  { %p2402_p2 = pnand %p2400_p1, %p2397_p0 }
   0xb   :  { %2405 = shalt.err (!%p2402_p2)
}
   0xc   :  { %s2406_s28 = scalar_lea.vmem %s40_s18, 1024  ;;  %p2411_p4 = scmp.lt.s32.totalorder %s40_s18, %s40_s18 }
   0xd   :  { %p2407_p3 = scmp.ne.s32.totalorder %s40_s18, %s2406_s28  ;;  %p2412_p5 = scmp.lt.s32.totalorder %s2406_s28, %s2406_s28 }
   0xf   :  { %p2413_p6 = por %p2412_p5, %p2411_p4 }
  0x11   :  { %p2414_p7 = pnand %p2413_p6, %p2407_p3 }
  0x13   :  { %2417 = shalt.err (!%p2414_p7)
}
  0x14   :  { %s2540_s29 = smov 64   ;;  %s2541_s30 = smov 4  }
  0x15   :  { %45 = dma.hbm_to_vmem [thread:$0]  %s3884_s1, 1024, %s40_s18, [#allocation6], %s2540_s29, %s2540_s29, %s2541_s30  }
  0x16   :  { %s2418_s16 = scalar_lea.hbm %s3883_s0, 1024 }
  0x17   :  { %p2419_p8 = scmp.ne.s32.totalorder %s3883_s0, %s2418_s16  ;;  %p2422_p9 = scmp.lt.u32.totalorder %s2418_s16, %s3883_s0 }
  0x19   :  { %p2424_p10 = pnand %p2422_p9, %p2419_p8 }
  0x1b   :  { %2427 = shalt.err (!%p2424_p10)
}
  0x1c   :  { %s2428_s23 = scalar_lea.vmem %s2610_s20, 1024  ;;  %p2433_p12 = scmp.lt.s32.totalorder %s2610_s20, %s2610_s20 }
  0x1d   :  { %p2429_p11 = scmp.ne.s32.totalorder %s2610_s20, %s2428_s23  ;;  %p2434_p13 = scmp.lt.s32.totalorder %s2428_s23, %s2428_s23 }
  0x1f   :  { %p2435_p0 = por %p2434_p13, %p2433_p12 }
  0x21   :  { %p2436_p1 = pnand %p2435_p0, %p2429_p11 }
  0x23   :  { %2439 = shalt.err (!%p2436_p1)
}
  0x24   :  { %33 = dma.hbm_to_vmem [thread:$0]  %s3883_s0, 1024, %s2610_s20, [#allocation3], %s2540_s29, %s2540_s29, %s2541_s30  }
  0x25   :  { %s2542_s24 = smov [#allocation7]   ;;  %s2543_s26 = smov [#allocation8]  }
  0x26   :  { %s55_s25 = sshll.u32 %s2542_s24, 4  ;;  %s71_s27 = sshll.u32 %s2543_s26, 4  ;;  %s56_s25 = int_to_ptr.vmem [resolvable:$true] %s55_s25  ;;  %s2647_s27 = int_to_ptr.vmem [resolvable:$true] %s71_s27 }
  0x27   :  { %s2440_s13 = scalar_lea.hbm %s3887_s4, 1024 }
  0x28   :  { %p2441_p2 = scmp.ne.s32.totalorder %s3887_s4, %s2440_s13  ;;  %p2444_p3 = scmp.lt.u32.totalorder %s2440_s13, %s3887_s4 }
  0x2a   :  { %p2446_p4 = pnand %p2444_p3, %p2441_p2 }
  0x2c   :  { %2449 = shalt.err (!%p2446_p4)
}
  0x2d   :  { %s2450_s0 = scalar_lea.vmem %s56_s25, 1024  ;;  %p2455_p6 = scmp.lt.s32.totalorder %s56_s25, %s56_s25 }
  0x2e   :  { %p2451_p5 = scmp.ne.s32.totalorder %s56_s25, %s2450_s0  ;;  %p2456_p7 = scmp.lt.s32.totalorder %s2450_s0, %s2450_s0 }
  0x30   :  { %p2457_p8 = por %p2456_p7, %p2455_p6 }
  0x32   :  { %p2458_p9 = pnand %p2457_p8, %p2451_p5 }
  0x34   :  { %2461 = shalt.err (!%p2458_p9)
}
  0x35   :  { %61 = dma.hbm_to_vmem [thread:$0]  %s3887_s4, 1024, %s56_s25, [#allocation6], %s2540_s29, %s2540_s29, %s2541_s30  }
  0x36   :  { %s2462_s23 = scalar_lea.hbm %s3890_s7, 4096 }
  0x37   :  { %p2463_p10 = scmp.ne.s32.totalorder %s3890_s7, %s2462_s23  ;;  %p2466_p11 = scmp.lt.u32.totalorder %s2462_s23, %s3890_s7 }
  0x39   :  { %p2468_p12 = pnand %p2466_p11, %p2463_p10 }
  0x3b   :  { %2471 = shalt.err (!%p2468_p12)
}
  0x3c   :  { %s2472_s28 = scalar_lea.vmem %s2647_s27, 4096  ;;  %p2477_p0 = scmp.lt.s32.totalorder %s2647_s27, %s2647_s27 }
  0x3d   :  { %p2473_p13 = scmp.ne.s32.totalorder %s2647_s27, %s2472_s28  ;;  %p2478_p1 = scmp.lt.s32.totalorder %s2472_s28, %s2472_s28 }
  0x3f   :  { %p2479_p2 = por %p2478_p1, %p2477_p0 }
  0x41   :  { %p2480_p3 = pnand %p2479_p2, %p2473_p13 }
  0x43   :  { %2483 = shalt.err (!%p2480_p3)
}
  0x44   :  { %s2544_s4 = smov 256   ;;  %s2545_s29 = smov 16  }
  0x45   :  { %77 = dma.hbm_to_vmem [thread:$0]  %s3890_s7, 4096, %s2647_s27, [#allocation9], %s2544_s4, %s2544_s4, %s2545_s29  }
  0x46   :  { %2528 = dma.done.wait [#allocation3], 1024  }
  0x47   :  { %2529 = vsyncadd [#allocation3], 4294966272 }
  0x48   :  { %2530 = dma.done.wait [#allocation6], 2048  }
  0x49   :  { %2531 = vsyncadd [#allocation6], 4294965248 }
  0x4a   :  { %2532 = dma.done.wait [#allocation9], 4096  }
  0x4b   :  { %2533 = vsyncadd [#allocation9], 4294963200  ;;  %v2216_v0 = vld [vmem:[#allocation5] sm:$0xff]   ;;  %v2217_v1 = vld [vmem:[#allocation5 + $0x8] sm:$0xff]  }
  0x4c   :  { %2140 = vmatprep.subr.bf16.mxu0 %v2216_v0  ;;  %v2218_v2 = vld [vmem:[#allocation5 + $0x10] sm:$0xff]   ;;  %v2219_v3 = vld [vmem:[#allocation5 + $0x18] sm:$0xff]   ;;  %v2224_v4 = vld [vmem:[#allocation2] sm:$0xff]  }
  0x4d   :  { %2141 = vmatpush3.bf16.msra.mxu0 %v2216_v0  ;;  %2156 = vmatprep.mubr.bf16.mxu0 %v2224_v4  ;;  %v2220_v5 = vld [vmem:[#allocation5 + $0x20] sm:$0xff]   ;;  %v2221_v6 = vld [vmem:[#allocation5 + $0x28] sm:$0xff]   ;;  %v2222_v7 = vld [vmem:[#allocation5 + $0x30] sm:$0xff]  }
  0x4e   :  { %2142 = vmatprep.subr.bf16.mxu0 %v2217_v1  ;;  %v2223_v8 = vld [vmem:[#allocation5 + $0x38] sm:$0xff]   ;;  %v2225_v9 = vld [vmem:[#allocation2 + $0x8] sm:$0xff]   ;;  %v2226_v10 = vld [vmem:[#allocation2 + $0x10] sm:$0xff]  }
  0x4f   :  { %v2227_v11 = vld [vmem:[#allocation2 + $0x18] sm:$0xff]   ;;  %v2228_v12 = vld [vmem:[#allocation2 + $0x20] sm:$0xff]   ;;  %v2229_v13 = vld [vmem:[#allocation2 + $0x28] sm:$0xff]  }
  0x50   :  { %v2230_v14 = vld [vmem:[#allocation2 + $0x30] sm:$0xff]   ;;  %v2231_v15 = vld [vmem:[#allocation2 + $0x38] sm:$0xff]   ;;  %v2232_v16 = vld [vmem:[#allocation7] sm:$0xff]  }
  0x51   :  { %2143 = vmatpush3.bf16.msra.mxu0 %v2217_v1  ;;  %2172 = vmatprep.subr.bf16.mxu1 %v2232_v16  ;;  %v2233_v17 = vld [vmem:[#allocation7 + $0x8] sm:$0xff]   ;;  %v2234_v18 = vld [vmem:[#allocation7 + $0x10] sm:$0xff]   ;;  %v2235_v19 = vld [vmem:[#allocation7 + $0x18] sm:$0xff]  }
  0x52   :  { %2144 = vmatprep.subr.bf16.mxu0 %v2218_v2  ;;  %2173 = vmatpush3.bf16.msra.mxu1 %v2232_v16  ;;  %v2236_v20 = vld [vmem:[#allocation7 + $0x20] sm:$0xff]   ;;  %v2237_v21 = vld [vmem:[#allocation7 + $0x28] sm:$0xff]   ;;  %v2238_v22 = vld [vmem:[#allocation7 + $0x30] sm:$0xff]  }
  0x53   :  { %2174 = vmatprep.subr.bf16.mxu1 %v2233_v17  ;;  %v2239_v23 = vld [vmem:[#allocation7 + $0x38] sm:$0xff]  }
  0x55   :  { %2145 = vmatpush3.bf16.msra.mxu0 %v2218_v2 }
  0x56   :  { %2146 = vmatprep.subr.bf16.mxu0 %v2219_v3  ;;  %2175 = vmatpush3.bf16.msra.mxu1 %v2233_v17 }
  0x57   :  { %2176 = vmatprep.subr.bf16.mxu1 %v2234_v18 }
  0x59   :  { %2147 = vmatpush3.bf16.msra.mxu0 %v2219_v3 }
  0x5a   :  { %2148 = vmatprep.subr.bf16.mxu0 %v2220_v5  ;;  %2177 = vmatpush3.bf16.msra.mxu1 %v2234_v18 }
  0x5b   :  { %2178 = vmatprep.subr.bf16.mxu1 %v2235_v19 }
  0x5d   :  { %2149 = vmatpush3.bf16.msra.mxu0 %v2220_v5 }
  0x5e   :  { %2150 = vmatprep.subr.bf16.mxu0 %v2221_v6  ;;  %2179 = vmatpush3.bf16.msra.mxu1 %v2235_v19 }
  0x5f   :  { %2180 = vmatprep.subr.bf16.mxu1 %v2236_v20 }
  0x61   :  { %2151 = vmatpush3.bf16.msra.mxu0 %v2221_v6 }
  0x62   :  { %2152 = vmatprep.subr.bf16.mxu0 %v2222_v7  ;;  %2181 = vmatpush3.bf16.msra.mxu1 %v2236_v20 }
  0x63   :  { %2182 = vmatprep.subr.bf16.mxu1 %v2237_v21 }
  0x65   :  { %2153 = vmatpush3.bf16.msra.mxu0 %v2222_v7 }
  0x66   :  { %2154 = vmatprep.subr.bf16.mxu0 %v2223_v8  ;;  %2183 = vmatpush3.bf16.msra.mxu1 %v2237_v21 }
  0x67   :  { %2184 = vmatprep.subr.bf16.mxu1 %v2238_v22 }
  0x69   :  { %2155 = vmatpush3.bf16.msra.mxu0 %v2223_v8 }
  0x6a   :  { %2185 = vmatpush3.bf16.msra.mxu1 %v2238_v22 }
  0x6b   :  { %2186 = vmatprep.subr.bf16.mxu1 %v2239_v23 }
  0x6c   :  { %2157 = vmatmul.mubr.bf16.vlgmr.msra.gmra.mrb[0].mxu0 %v2225_v9 }
  0x6d   :  { %2160 = vmatprep.mubr.bf16.mxu0 %v2226_v10 }
  0x6e   :  { %2187 = vmatpush3.bf16.msra.mxu1 %v2239_v23 }
  0x74   :  { %2161 = vmatmul.mubr.bf16.gmra.mrb[4].mxu0 %v2227_v11 }
  0x75   :  { %2164 = vmatprep.mubr.bf16.mxu0 %v2228_v12 }
  0x7c   :  { %2165 = vmatmul.mubr.bf16.gmra.mrb[8].mxu0 %v2229_v13 }
  0x7d   :  { %2168 = vmatprep.mubr.bf16.mxu0 %v2230_v14 }
  0x84   :  { %2169 = vmatmul.mubr.bf16.gmra.mrb[12].mxu0 %v2231_v15 }
 0x13f   :  { %v2158_v24 = vpop.f32.mrb[0].mxu0 }
 0x140   :  { %v257_v25 = vpop.f32.mrb[1].mxu0 }
 0x141   :  { %v2159_v26 = vpop.f32.mrb[2].mxu0 }
 0x142   :  { %v260_v27 = vpop.f32.mrb[3].mxu0 }
 0x143   :  { %v322_v28 = vadd.f32 %v260_v27, %v257_v25 }
 0x145   :  { %v323_v29 = vadd.f32 %v2158_v24, %v322_v28 }
 0x147   :  { %v2162_v30 = vpop.f32.mrb[4].mxu0  ;;  %v324_v31 = vadd.f32 %v2159_v26, %v323_v29 }
 0x148   :  { %v273_v32 = vpop.f32.mrb[5].mxu0 }
 0x149   :  { %v325_v33 = vadd.f32 %v324_v31, %v273_v32  ;;  %v2163_v34 = vpop.f32.mrb[6].mxu0 }
 0x14a   :  { %v276_v35 = vpop.f32.mrb[7].mxu0 }
 0x14b   :  { %v326_v36 = vadd.f32 %v325_v33, %v276_v35 }
 0x14d   :  { %v327_v37 = vadd.f32 %v2162_v30, %v326_v36 }
 0x14f   :  { %v2166_v38 = vpop.f32.mrb[8].mxu0  ;;  %v328_v39 = vadd.f32 %v2163_v34, %v327_v37 }
 0x150   :  { %v289_v40 = vpop.f32.mrb[9].mxu0 }
 0x151   :  { %v329_v41 = vadd.f32 %v328_v39, %v289_v40  ;;  %v2167_v42 = vpop.f32.mrb[10].mxu0 }
 0x152   :  { %v292_v43 = vpop.f32.mrb[11].mxu0 }
 0x153   :  { %v330_v44 = vadd.f32 %v329_v41, %v292_v43 }
 0x155   :  { %v331_v45 = vadd.f32 %v2166_v38, %v330_v44 }
 0x157   :  { %v2170_v46 = vpop.f32.mrb[12].mxu0  ;;  %v332_v47 = vadd.f32 %v2167_v42, %v331_v45 }
 0x158   :  { %v305_v48 = vpop.f32.mrb[13].mxu0 }
 0x159   :  { %v333_v49 = vadd.f32 %v332_v47, %v305_v48  ;;  %v2171_v50 = vpop.f32.mrb[14].mxu0 }
 0x15a   :  { %v308_v51 = vpop.f32.mrb[15].mxu0 }
 0x15b   :  { %v334_v52 = vadd.f32 %v333_v49, %v308_v51 }
 0x15d   :  { %v335_v53 = vadd.f32 %v2170_v46, %v334_v52 }
 0x15f   :  { %v336_v54 = vadd.f32 %v2171_v50, %v335_v53  ;;  %v402_v53 = vlaneseq }
 0x161   :  { %v337_v55 = vrot.slane %v336_v54, 4 }
 0x163   :  { %v338_v56 = vadd.f32 %v337_v55, %v336_v54  ;;  %v2744_v54 = vshrl.u32 %v402_v53, 7  ;;  %v320_v55 = vld [vmem:[%s3885_s2] sm:$0x1] }
 0x165   :  { %v339_v57 = vrot.slane %v338_v56, 2  ;;  %3953 = vst [vmem:[#allocation18_spill] sm:$0xff] %v2744_v54 }
 0x167   :  { %v340_v58 = vadd.f32 %v339_v57, %v338_v56  ;;  %v2750_v56 = vsub.s32 0, %v2744_v54 }
 0x169   :  { %v341_v59 = vrot.slane %v340_v58, 1  ;;  %3954 = vst [vmem:[#allocation19_spill] sm:$0xff] %v2750_v56 }
 0x16b   :  { %v342_v60 = vadd.f32 %v341_v59, %v340_v58 }
 0x16d   :  { %v343_v61 = vmul.f32 0.0078125, %v342_v60  ;;  %v2066_v60 = vld [vmem:[%s3886_s3] ss:$0 sm:$0xff] }
 0x16f   :  { %v2684_v62 = vsub.f32 %v257_v25, %v343_v61  ;;  %v2686_v63 = vsub.f32 %v260_v27, %v343_v61  ;;  %v2688_v0 = vsub.f32 %v2158_v24, %v343_v61  ;;  %v2690_v1 = vsub.f32 %v2159_v26, %v343_v61 }
 0x170   :  { %v2692_v2 = vsub.f32 %v273_v32, %v343_v61  ;;  %v2694_v3 = vsub.f32 %v276_v35, %v343_v61  ;;  %v2696_v4 = vsub.f32 %v2162_v30, %v343_v61  ;;  %v2698_v5 = vsub.f32 %v2163_v34, %v343_v61 }
 0x171   :  { %v2700_v6 = vsub.f32 %v289_v40, %v343_v61  ;;  %v2702_v7 = vsub.f32 %v292_v43, %v343_v61  ;;  %v2704_v8 = vsub.f32 %v2166_v38, %v343_v61  ;;  %v2706_v9 = vsub.f32 %v2167_v42, %v343_v61 }
 0x172   :  { %v2708_v10 = vsub.f32 %v305_v48, %v343_v61  ;;  %v357_v11 = vsub.f32 %v308_v51, %v343_v61  ;;  %v2710_v12 = vsub.f32 %v2170_v46, %v343_v61  ;;  %v2712_v13 = vsub.f32 %v2171_v50, %v343_v61 }
 0x173   :  { %v360_v14 = vmul.f32 %v2684_v62, %v2684_v62  ;;  %v361_v15 = vmul.f32 %v2686_v63, %v2686_v63  ;;  %v362_v16 = vmul.f32 %v2688_v0, %v2688_v0  ;;  %v363_v18 = vmul.f32 %v2690_v1, %v2690_v1 }
 0x174   :  { %v364_v20 = vmul.f32 %v2692_v2, %v2692_v2  ;;  %v365_v22 = vmul.f32 %v2694_v3, %v2694_v3  ;;  %v366_v24 = vmul.f32 %v2696_v4, %v2696_v4  ;;  %v367_v26 = vmul.f32 %v2698_v5, %v2698_v5 }
 0x175   :  { %v376_v17 = vadd.f32 %v361_v15, %v360_v14  ;;  %v368_v28 = vmul.f32 %v2700_v6, %v2700_v6  ;;  %v369_v30 = vmul.f32 %v2702_v7, %v2702_v7  ;;  %v370_v32 = vmul.f32 %v2704_v8, %v2704_v8 }
 0x176   :  { %v371_v34 = vmul.f32 %v2706_v9, %v2706_v9  ;;  %v372_v36 = vmul.f32 %v2708_v10, %v2708_v10  ;;  %v373_v38 = vmul.f32 %v357_v11, %v357_v11  ;;  %v374_v40 = vmul.f32 %v2710_v12, %v2710_v12 }
 0x177   :  { %v377_v19 = vadd.f32 %v376_v17, %v362_v16  ;;  %v375_v42 = vmul.f32 %v2712_v13, %v2712_v13 }
 0x179   :  { %v378_v21 = vadd.f32 %v377_v19, %v363_v18 }
 0x17b   :  { %v379_v23 = vadd.f32 %v378_v21, %v364_v20 }
 0x17d   :  { %v380_v25 = vadd.f32 %v379_v23, %v365_v22 }
 0x17f   :  { %v381_v27 = vadd.f32 %v380_v25, %v366_v24 }
 0x181   :  { %v382_v29 = vadd.f32 %v381_v27, %v367_v26 }
 0x183   :  { %v383_v31 = vadd.f32 %v382_v29, %v368_v28 }
 0x185   :  { %v384_v33 = vadd.f32 %v383_v31, %v369_v30 }
 0x187   :  { %v385_v35 = vadd.f32 %v384_v33, %v370_v32 }
 0x189   :  { %v386_v37 = vadd.f32 %v385_v35, %v371_v34 }
 0x18b   :  { %v387_v39 = vadd.f32 %v386_v37, %v372_v36 }
 0x18d   :  { %v388_v41 = vadd.f32 %v387_v39, %v373_v38 }
 0x18f   :  { %v389_v43 = vadd.f32 %v388_v41, %v374_v40 }
 0x191   :  { %v390_v44 = vadd.f32 %v389_v43, %v375_v42 }
 0x193   :  { %v391_v45 = vrot.slane %v390_v44, 4 }
 0x195   :  { %v392_v46 = vadd.f32 %v391_v45, %v390_v44 }
 0x197   :  { %v393_v47 = vrot.slane %v392_v46, 2 }
 0x199   :  { %v394_v48 = vadd.f32 %v393_v47, %v392_v46 }
 0x19b   :  { %v395_v49 = vrot.slane %v394_v48, 1 }
 0x19d   :  { %v396_v50 = vadd.f32 %v395_v49, %v394_v48 }
 0x19f   :  { %v397_v51 = vmul.f32 0.0078125, %v396_v50 }
 0x1a1   :  { %v398_v52 = vadd.f32 1e-05, %v397_v51 }
 0x1a3   :  { %2288 = vrsqrt.f32 %v398_v52 }
 0x1ad   :  { %v2289_v57 = vpop.eup %2288 }
 0x1ae   :  { %v400_v58 = vmul.f32 %v2289_v57, %v320_v55  ;;  %v2245_v57 = vld [vmem:[#allocation8 + $0xc] ss:$16 sps:$4 sm:$0xff]  }
 0x1af   :  { %1084 = vmatprep.subr.bf16.mxu1 %v2245_v57 }
 0x1b0   :  { %v405_v59 = vrot.slane %v400_v58, %v2750_v56  ;;  %v2240_v58 = vld [vmem:[#allocation8] ss:$16 sps:$4 sm:$0xff]  }
 0x1b2   :  { %v420_v61 = vmul.f32 %v405_v59, %v357_v11  ;;  %v407_v14 = vmul.f32 %v405_v59, %v2684_v62  ;;  %v408_v15 = vmul.f32 %v405_v59, %v2686_v63  ;;  %v409_v16 = vmul.f32 %v405_v59, %v2688_v0 }
 0x1b3   :  { %v410_v17 = vmul.f32 %v405_v59, %v2690_v1  ;;  %v411_v18 = vmul.f32 %v405_v59, %v2692_v2  ;;  %v412_v19 = vmul.f32 %v405_v59, %v2694_v3  ;;  %v413_v20 = vmul.f32 %v405_v59, %v2696_v4 }
 0x1b4   :  { %v442_v21 = vadd.f32 %v2066_v60, %v420_v61  ;;  %v429_v22 = vadd.f32 %v2066_v60, %v407_v14  ;;  %v430_v23 = vadd.f32 %v2066_v60, %v408_v15  ;;  %v431_v24 = vadd.f32 %v2066_v60, %v409_v16  ;;  %v2243_v61 = vld [vmem:[#allocation8 + $0x8] ss:$16 sps:$4 sm:$0xff]   ;;  %v2254_v15 = vld [vmem:[#allocation8 + $0x44] ss:$16 sps:$4 sm:$0xff]   ;;  %v2257_v16 = vld [vmem:[#allocation8 + $0x4c] ss:$16 sps:$4 sm:$0xff]  }
 0x1b5   :  { %v432_v25 = vadd.f32 %v2066_v60, %v410_v17  ;;  %v433_v11 = vadd.f32 %v2066_v60, %v411_v18  ;;  %v434_v26 = vadd.f32 %v2066_v60, %v412_v19  ;;  %v414_v62 = vmul.f32 %v405_v59, %v2698_v5  ;;  %v2249_v14 = vld [vmem:[#allocation8 + $0x28] ss:$16 sps:$4 sm:$0xff]   ;;  %v2252_v17 = vld [vmem:[#allocation8 + $0x40] ss:$16 sps:$4 sm:$0xff]   ;;  %v2260_v19 = vld [vmem:[#allocation8 + $0x64] ss:$16 sps:$4 sm:$0xff]  }
 0x1b6   :  { %v445_v63 = vmax.f32 %v429_v22, 0.0  ;;  %v446_v27 = vmax.f32 %v430_v23, 0.0  ;;  %v447_v0 = vmax.f32 %v431_v24, 0.0  ;;  %v435_v28 = vadd.f32 %v2066_v60, %v413_v20  ;;  %v2255_v18 = vld [vmem:[#allocation8 + $0x48] ss:$16 sps:$4 sm:$0xff]  }
 0x1b7   :  { %v448_v1 = vmax.f32 %v432_v25, 0.0  ;;  %v449_v29 = vmax.f32 %v433_v11, 0.0  ;;  %v450_v2 = vmax.f32 %v434_v26, 0.0  ;;  %v436_v30 = vadd.f32 %v2066_v60, %v414_v62  ;;  %v2263_v20 = vld [vmem:[#allocation8 + $0x6c] ss:$16 sps:$4 sm:$0xff]  }
 0x1b8   :  { %v461_v3 = vpack.c.bf16 %v446_v27, %v445_v63  ;;  %v451_v31 = vmax.f32 %v435_v28, 0.0  ;;  %v415_v4 = vmul.f32 %v405_v59, %v2700_v6  ;;  %v416_v32 = vmul.f32 %v405_v59, %v2702_v7  ;;  %v2261_v22 = vld [vmem:[#allocation8 + $0x68] ss:$16 sps:$4 sm:$0xff]   ;;  %v2266_v23 = vld [vmem:[#allocation8 + $0x84] ss:$16 sps:$4 sm:$0xff]  }
 0x1b9   :  { %v462_v33 = vpack.c.bf16 %v448_v1, %v447_v0  ;;  %v463_v34 = vpack.c.bf16 %v450_v2, %v449_v29  ;;  %v452_v35 = vmax.f32 %v436_v30, 0.0  ;;  %v417_v36 = vmul.f32 %v405_v59, %v2704_v8  ;;  %v2269_v24 = vld [vmem:[#allocation8 + $0x8c] ss:$16 sps:$4 sm:$0xff]   ;;  %v2264_v25 = vld [vmem:[#allocation8 + $0x80] ss:$16 sps:$4 sm:$0xff]  }
 0x1ba   :  { %2188 = vmatprep.mubr.bf16.mxu1 %v461_v3  ;;  %v437_v5 = vadd.f32 %v2066_v60, %v415_v4  ;;  %v438_v37 = vadd.f32 %v2066_v60, %v416_v32  ;;  %v418_v38 = vmul.f32 %v405_v59, %v2706_v9  ;;  %v419_v39 = vmul.f32 %v405_v59, %v2708_v10  ;;  %v2267_v11 = vld [vmem:[#allocation8 + $0x88] ss:$16 sps:$4 sm:$0xff]   ;;  %v2272_v26 = vld [vmem:[#allocation8 + $0xa4] ss:$16 sps:$4 sm:$0xff]   ;;  %v2275_v62 = vld [vmem:[#allocation8 + $0xac] ss:$16 sps:$4 sm:$0xff]  }
 0x1bb   :  { %2189 = vmatmul.mubr.bf16.vlgmr.msra.gmra.mrb[0].mxu1 %v462_v33  ;;  %v464_v40 = vpack.c.bf16 %v452_v35, %v451_v31  ;;  %v439_v41 = vadd.f32 %v2066_v60, %v417_v36  ;;  %v458_v42 = vmax.f32 %v442_v21, 0.0  ;;  %v421_v6 = vmul.f32 %v405_v59, %v2710_v12  ;;  %v2242_v12 = vld [vmem:[#allocation8 + $0x4] ss:$16 sps:$4 sm:$0xff]   ;;  %v2258_v21 = vld [vmem:[#allocation8 + $0x60] ss:$16 sps:$4 sm:$0xff]  }
 0x1bc   :  { %2192 = vmatprep.mubr.bf16.mxu1 %v463_v34  ;;  %v453_v7 = vmax.f32 %v437_v5, 0.0  ;;  %v454_v43 = vmax.f32 %v438_v37, 0.0  ;;  %v440_v44 = vadd.f32 %v2066_v60, %v418_v38  ;;  %v441_v45 = vadd.f32 %v2066_v60, %v419_v39  ;;  %971 = vmatprep.subr.bf16.mxu0 %v2242_v12  ;;  %v2270_v63 = vld [vmem:[#allocation8 + $0xa0] ss:$16 sps:$4 sm:$0xff]   ;;  %v2273_v27 = vld [vmem:[#allocation8 + $0xa8] ss:$16 sps:$4 sm:$0xff]  }
 0x1bd   :  { %v455_v46 = vmax.f32 %v439_v41, 0.0  ;;  %v422_v8 = vmul.f32 %v405_v59, %v2712_v13  ;;  %v443_v47 = vadd.f32 %v2066_v60, %v421_v6  ;;  %972 = vmatpush1.bf16.msra.mxu0 %v2240_v58  ;;  %1085 = vmatpush1.bf16.msra.mxu1 %v2243_v61  ;;  %v2248_v13 = vld [vmem:[#allocation8 + $0x24] ss:$16 sps:$4 sm:$0xff]   ;;  %v2251_v59 = vld [vmem:[#allocation8 + $0x2c] ss:$16 sps:$4 sm:$0xff]   ;;  %v2546_v3 = vmov 0  }
 0x1be   :  { %v465_v48 = vpack.c.bf16 %v454_v43, %v453_v7  ;;  %v456_v49 = vmax.f32 %v440_v44, 0.0  ;;  %v457_v9 = vmax.f32 %v441_v45, 0.0  ;;  %973 = vmatprep.subr.bf16.mxu0 %v2248_v13  ;;  %1086 = vmatprep.subr.bf16.mxu1 %v2251_v59  ;;  %v2278_v0 = vld [vmem:[#allocation8 + $0xc4] ss:$16 sps:$4 sm:$0xff]   ;;  %v2281_v28 = vld [vmem:[#allocation8 + $0xcc] ss:$16 sps:$4 sm:$0xff]  }
 0x1bf   :  { %v444_v50 = vadd.f32 %v2066_v60, %v422_v8  ;;  %v459_v10 = vmax.f32 %v443_v47, 0.0  ;;  %v2246_v60 = vld [vmem:[#allocation8 + $0x20] ss:$16 sps:$4 sm:$0xff]   ;;  %v2279_v29 = vld [vmem:[#allocation8 + $0xc8] ss:$16 sps:$4 sm:$0xff]   ;;  %1003 = vmatprep.mubr.bf16.mxu0 %v2546_v3 }
 0x1c0   :  { %v466_v51 = vpack.c.bf16 %v456_v49, %v455_v46  ;;  %v467_v52 = vpack.c.bf16 %v458_v42, %v457_v9  ;;  %v2276_v1 = vld [vmem:[#allocation8 + $0xc0] ss:$16 sps:$4 sm:$0xff]   ;;  %v2284_v2 = vld [vmem:[#allocation8 + $0xe4] ss:$16 sps:$4 sm:$0xff]   ;;  %v2287_v30 = vld [vmem:[#allocation8 + $0xec] ss:$16 sps:$4 sm:$0xff]  }
 0x1c1   :  { %v460_v53 = vmax.f32 %v444_v50, 0.0  ;;  %974 = vmatpush1.bf16.msra.mxu0 %v2246_v60  ;;  %1087 = vmatpush1.bf16.msra.mxu1 %v2249_v14  ;;  %v2282_v31 = vld [vmem:[#allocation8 + $0xe0] ss:$16 sps:$4 sm:$0xff]   ;;  %v2285_v4 = vld [vmem:[#allocation8 + $0xe8] ss:$16 sps:$4 sm:$0xff]  }
 0x1c2   :  { %975 = vmatprep.subr.bf16.mxu0 %v2254_v15  ;;  %1088 = vmatprep.subr.bf16.mxu1 %v2257_v16 }
 0x1c3   :  { %2193 = vmatmul.mubr.bf16.gmra.mrb[4].mxu1 %v464_v40  ;;  %v468_v55 = vpack.c.bf16 %v460_v53, %v459_v10 }
 0x1c4   :  { %2196 = vmatprep.mubr.bf16.mxu1 %v465_v48 }
 0x1c5   :  { %976 = vmatpush1.bf16.msra.mxu0 %v2252_v17  ;;  %1089 = vmatpush1.bf16.msra.mxu1 %v2255_v18 }
 0x1c6   :  { %977 = vmatprep.subr.bf16.mxu0 %v2260_v19  ;;  %1090 = vmatprep.subr.bf16.mxu1 %v2263_v20 }
 0x1c9   :  { %978 = vmatpush1.bf16.msra.mxu0 %v2258_v21  ;;  %1091 = vmatpush1.bf16.msra.mxu1 %v2261_v22 }
 0x1ca   :  { %979 = vmatprep.subr.bf16.mxu0 %v2266_v23  ;;  %1092 = vmatprep.subr.bf16.mxu1 %v2269_v24 }
 0x1cb   :  { %2197 = vmatmul.mubr.bf16.gmra.mrb[8].mxu1 %v466_v51 }
 0x1cc   :  { %2200 = vmatprep.mubr.bf16.mxu1 %v467_v52 }
 0x1cd   :  { %980 = vmatpush1.bf16.msra.mxu0 %v2264_v25  ;;  %1093 = vmatpush1.bf16.msra.mxu1 %v2267_v11 }
 0x1ce   :  { %981 = vmatprep.subr.bf16.mxu0 %v2272_v26  ;;  %1094 = vmatprep.subr.bf16.mxu1 %v2275_v62 }
 0x1d1   :  { %982 = vmatpush1.bf16.msra.mxu0 %v2270_v63  ;;  %1095 = vmatpush1.bf16.msra.mxu1 %v2273_v27 }
 0x1d2   :  { %983 = vmatprep.subr.bf16.mxu0 %v2278_v0  ;;  %1096 = vmatprep.subr.bf16.mxu1 %v2281_v28 }
 0x1d3   :  { %2201 = vmatmul.mubr.bf16.gmra.mrb[12].mxu1 %v468_v55 }
 0x1d4   :  { %1116 = vmatprep.mubr.bf16.mxu1 %v2546_v3 }
 0x1d5   :  { %984 = vmatpush1.bf16.msra.mxu0 %v2276_v1  ;;  %1097 = vmatpush1.bf16.msra.mxu1 %v2279_v29 }
 0x1d6   :  { %985 = vmatprep.subr.bf16.mxu0 %v2284_v2  ;;  %1098 = vmatprep.subr.bf16.mxu1 %v2287_v30 }
 0x1d9   :  { %986 = vmatpush1.bf16.msra.mxu0 %v2282_v31  ;;  %1099 = vmatpush1.bf16.msra.mxu1 %v2285_v4 }
 0x28e   :  { %v2190_v32 = vpop.f32.mrb[0].mxu1 }
 0x28f   :  { %v567_v33 = vpop.f32.mrb[1].mxu1 }
 0x290   :  { %v2191_v34 = vpop.f32.mrb[2].mxu1 }
 0x291   :  { %v570_v35 = vpop.f32.mrb[3].mxu1 }
 0x292   :  { %v632_v36 = vadd.f32 %v570_v35, %v567_v33 }
 0x294   :  { %v633_v5 = vadd.f32 %v2190_v32, %v632_v36 }
 0x296   :  { %v2194_v37 = vpop.f32.mrb[4].mxu1  ;;  %v634_v38 = vadd.f32 %v2191_v34, %v633_v5 }
 0x297   :  { %v583_v39 = vpop.f32.mrb[5].mxu1 }
 0x298   :  { %v635_v40 = vadd.f32 %v634_v38, %v583_v39  ;;  %v2195_v41 = vpop.f32.mrb[6].mxu1 }
 0x299   :  { %v586_v42 = vpop.f32.mrb[7].mxu1 }
 0x29a   :  { %v636_v6 = vadd.f32 %v635_v40, %v586_v42 }
 0x29c   :  { %v637_v7 = vadd.f32 %v2194_v37, %v636_v6 }
 0x29e   :  { %v2198_v43 = vpop.f32.mrb[8].mxu1  ;;  %v638_v44 = vadd.f32 %v2195_v41, %v637_v7 }
 0x29f   :  { %v599_v45 = vpop.f32.mrb[9].mxu1 }
 0x2a0   :  { %v639_v46 = vadd.f32 %v638_v44, %v599_v45  ;;  %v2199_v8 = vpop.f32.mrb[10].mxu1 }
 0x2a1   :  { %v602_v47 = vpop.f32.mrb[11].mxu1 }
 0x2a2   :  { %v640_v48 = vadd.f32 %v639_v46, %v602_v47 }
 0x2a4   :  { %v641_v49 = vadd.f32 %v2198_v43, %v640_v48 }
 0x2a6   :  { %v2202_v9 = vpop.f32.mrb[12].mxu1  ;;  %v642_v50 = vadd.f32 %v2199_v8, %v641_v49 }
 0x2a7   :  { %v615_v10 = vpop.f32.mrb[13].mxu1 }
 0x2a8   :  { %v643_v51 = vadd.f32 %v642_v50, %v615_v10  ;;  %v2203_v52 = vpop.f32.mrb[14].mxu1 }
 0x2a9   :  { %v618_v53 = vpop.f32.mrb[15].mxu1 }
 0x2aa   :  { %v644_v55 = vadd.f32 %v643_v51, %v618_v53 }
 0x2ac   :  { %v645_v12 = vadd.f32 %v2202_v9, %v644_v55 }
 0x2ae   :  { %v646_v57 = vadd.f32 %v2203_v52, %v645_v12 }
 0x2b0   :  { %v647_v58 = vrot.slane %v646_v57, 4 }
 0x2b2   :  { %v648_v61 = vadd.f32 %v647_v58, %v646_v57 }
 0x2b4   :  { %v649_v13 = vrot.slane %v648_v61, 2 }
 0x2b6   :  { %v650_v59 = vadd.f32 %v649_v13, %v648_v61  ;;  %v630_v61 = vld [vmem:[%s3888_s5] sm:$0x1] }
 0x2b8   :  { %v651_v60 = vrot.slane %v650_v59, 1 }
 0x2ba   :  { %v652_v14 = vadd.f32 %v651_v60, %v650_v59 }
 0x2bc   :  { %v653_v15 = vmul.f32 0.0078125, %v652_v14  ;;  %v2834_v14 = vld [vmem:[%s3889_s6] ss:$0 sm:$0xff] }
 0x2be   :  { %v654_v16 = vsub.f32 %v567_v33, %v653_v15  ;;  %v655_v17 = vsub.f32 %v570_v35, %v653_v15  ;;  %v2773_v18 = vsub.f32 %v2190_v32, %v653_v15  ;;  %v2775_v19 = vsub.f32 %v2191_v34, %v653_v15 }
 0x2bf   :  { %v2777_v20 = vsub.f32 %v583_v39, %v653_v15  ;;  %v2779_v21 = vsub.f32 %v586_v42, %v653_v15  ;;  %v2781_v22 = vsub.f32 %v2194_v37, %v653_v15  ;;  %v2783_v23 = vsub.f32 %v2195_v41, %v653_v15 }
 0x2c0   :  { %v2785_v24 = vsub.f32 %v599_v45, %v653_v15  ;;  %v2787_v25 = vsub.f32 %v602_v47, %v653_v15  ;;  %v2789_v11 = vsub.f32 %v2198_v43, %v653_v15  ;;  %v2791_v26 = vsub.f32 %v2199_v8, %v653_v15 }
 0x2c1   :  { %v2793_v62 = vsub.f32 %v615_v10, %v653_v15  ;;  %v667_v63 = vsub.f32 %v618_v53, %v653_v15  ;;  %v2795_v27 = vsub.f32 %v2202_v9, %v653_v15  ;;  %v2797_v0 = vsub.f32 %v2203_v52, %v653_v15 }
 0x2c2   :  { %v670_v28 = vmul.f32 %v654_v16, %v654_v16  ;;  %v671_v1 = vmul.f32 %v655_v17, %v655_v17  ;;  %v672_v29 = vmul.f32 %v2773_v18, %v2773_v18  ;;  %v673_v30 = vmul.f32 %v2775_v19, %v2775_v19 }
 0x2c3   :  { %v674_v4 = vmul.f32 %v2777_v20, %v2777_v20  ;;  %v675_v33 = vmul.f32 %v2779_v21, %v2779_v21  ;;  %v676_v35 = vmul.f32 %v2781_v22, %v2781_v22  ;;  %v677_v5 = vmul.f32 %v2783_v23, %v2783_v23 }
 0x2c4   :  { %v686_v2 = vadd.f32 %v671_v1, %v670_v28  ;;  %v678_v38 = vmul.f32 %v2785_v24, %v2785_v24  ;;  %v679_v40 = vmul.f32 %v2787_v25, %v2787_v25  ;;  %v680_v42 = vmul.f32 %v2789_v11, %v2789_v11 }
 0x2c5   :  { %v681_v7 = vmul.f32 %v2791_v26, %v2791_v26  ;;  %v682_v44 = vmul.f32 %v2793_v62, %v2793_v62  ;;  %v683_v46 = vmul.f32 %v667_v63, %v667_v63  ;;  %v684_v47 = vmul.f32 %v2795_v27, %v2795_v27 }
 0x2c6   :  { %v687_v31 = vadd.f32 %v686_v2, %v672_v29  ;;  %v685_v49 = vmul.f32 %v2797_v0, %v2797_v0 }
 0x2c8   :  { %v688_v32 = vadd.f32 %v687_v31, %v673_v30 }
 0x2ca   :  { %v689_v34 = vadd.f32 %v688_v32, %v674_v4 }
 0x2cc   :  { %v690_v36 = vadd.f32 %v689_v34, %v675_v33 }
 0x2ce   :  { %v691_v37 = vadd.f32 %v690_v36, %v676_v35 }
 0x2d0   :  { %v692_v39 = vadd.f32 %v691_v37, %v677_v5 }
 0x2d2   :  { %v693_v41 = vadd.f32 %v692_v39, %v678_v38 }
 0x2d4   :  { %v694_v6 = vadd.f32 %v693_v41, %v679_v40 }
 0x2d6   :  { %v695_v43 = vadd.f32 %v694_v6, %v680_v42 }
 0x2d8   :  { %v696_v45 = vadd.f32 %v695_v43, %v681_v7 }
 0x2da   :  { %v697_v8 = vadd.f32 %v696_v45, %v682_v44 }
 0x2dc   :  { %v698_v48 = vadd.f32 %v697_v8, %v683_v46 }
 0x2de   :  { %v699_v9 = vadd.f32 %v698_v48, %v684_v47 }
 0x2e0   :  { %v700_v50 = vadd.f32 %v699_v9, %v685_v49 }
 0x2e2   :  { %v701_v10 = vrot.slane %v700_v50, 4 }
 0x2e4   :  { %v702_v51 = vadd.f32 %v701_v10, %v700_v50 }
 0x2e6   :  { %v703_v52 = vrot.slane %v702_v51, 2 }
 0x2e8   :  { %v704_v53 = vadd.f32 %v703_v52, %v702_v51 }
 0x2ea   :  { %v705_v55 = vrot.slane %v704_v53, 1 }
 0x2ec   :  { %v706_v12 = vadd.f32 %v705_v55, %v704_v53 }
 0x2ee   :  { %v707_v57 = vmul.f32 0.0078125, %v706_v12 }
 0x2f0   :  { %v708_v58 = vadd.f32 1e-05, %v707_v57 }
 0x2f2   :  { %2290 = vrsqrt.f32 %v708_v58 }
 0x2fc   :  { %v2291_v13 = vpop.eup %2290 }
 0x2fd   :  { %v710_v59 = vmul.f32 %v2291_v13, %v630_v61 }
 0x2ff   :  { %v2829_v60 = vrot.slane %v710_v59, %v2750_v56 }
 0x301   :  { %v730_v15 = vmul.f32 %v2829_v60, %v667_v63  ;;  %v717_v28 = vmul.f32 %v2829_v60, %v654_v16  ;;  %v718_v1 = vmul.f32 %v2829_v60, %v655_v17  ;;  %v719_v30 = vmul.f32 %v2829_v60, %v2773_v18 }
 0x302   :  { %v720_v31 = vmul.f32 %v2829_v60, %v2775_v19  ;;  %v729_v17 = vmul.f32 %v2829_v60, %v2793_v62  ;;  %v721_v35 = vmul.f32 %v2829_v60, %v2777_v20  ;;  %v722_v36 = vmul.f32 %v2829_v60, %v2779_v21 }
 0x303   :  { %v739_v29 = vadd.f32 %v2834_v14, %v717_v28  ;;  %v740_v2 = vadd.f32 %v2834_v14, %v718_v1  ;;  %v741_v34 = vadd.f32 %v2834_v14, %v719_v30  ;;  %v752_v16 = vadd.f32 %v2834_v14, %v730_v15 }
 0x304   :  { %v742_v63 = vadd.f32 %v2834_v14, %v720_v31  ;;  %v751_v5 = vadd.f32 %v2834_v14, %v729_v17  ;;  %v743_v40 = vadd.f32 %v2834_v14, %v721_v35  ;;  %v744_v41 = vadd.f32 %v2834_v14, %v722_v36 }
 0x305   :  { %v755_v4 = vmax.f32 %v739_v29, 0.0  ;;  %v756_v32 = vmax.f32 %v740_v2, 0.0  ;;  %v757_v18 = vmax.f32 %v741_v34, 0.0  ;;  %v768_v37 = vmax.f32 %v752_v16, 0.0 }
 0x306   :  { %v758_v19 = vmax.f32 %v742_v63, 0.0  ;;  %v767_v38 = vmax.f32 %v751_v5, 0.0  ;;  %v759_v20 = vmax.f32 %v743_v40, 0.0  ;;  %v760_v62 = vmax.f32 %v744_v41, 0.0 }
 0x307   :  { %v771_v33 = vpack.c.bf16 %v756_v32, %v755_v4  ;;  %v723_v21 = vmul.f32 %v2829_v60, %v2781_v22  ;;  %v724_v6 = vmul.f32 %v2829_v60, %v2783_v23  ;;  %v725_v8 = vmul.f32 %v2829_v60, %v2785_v24 }
 0x308   :  { %v772_v39 = vpack.c.bf16 %v758_v19, %v757_v18  ;;  %v777_v42 = vpack.c.bf16 %v768_v37, %v767_v38  ;;  %v773_v7 = vpack.c.bf16 %v760_v62, %v759_v20  ;;  %v726_v22 = vmul.f32 %v2829_v60, %v2787_v25 }
 0x309   :  { %1004 = vmatmul.mubr.bf16.vlgmr.msra.gmra.mrb[16].mxu0 %v771_v33  ;;  %1117 = vmatmul.mubr.bf16.vlgmr.msra.gmra.mrb[16].mxu1 %v771_v33  ;;  %v745_v43 = vadd.f32 %v2834_v14, %v723_v21  ;;  %v746_v44 = vadd.f32 %v2834_v14, %v724_v6  ;;  %v747_v47 = vadd.f32 %v2834_v14, %v725_v8 }
 0x30a   :  { %1013 = vmatprep.mubr.bf16.mxu0 %v2546_v3  ;;  %1126 = vmatprep.mubr.bf16.mxu1 %v2546_v3  ;;  %v748_v48 = vadd.f32 %v2834_v14, %v726_v22  ;;  %v727_v50 = vmul.f32 %v2829_v60, %v2789_v11  ;;  %v728_v24 = vmul.f32 %v2829_v60, %v2791_v26 }
 0x30b   :  { %v761_v45 = vmax.f32 %v745_v43, 0.0  ;;  %v762_v46 = vmax.f32 %v746_v44, 0.0  ;;  %v763_v49 = vmax.f32 %v747_v47, 0.0  ;;  %v731_v11 = vmul.f32 %v2829_v60, %v2795_v27 }
 0x30c   :  { %v764_v9 = vmax.f32 %v748_v48, 0.0  ;;  %v749_v10 = vadd.f32 %v2834_v14, %v727_v50  ;;  %v750_v51 = vadd.f32 %v2834_v14, %v728_v24  ;;  %v732_v26 = vmul.f32 %v2829_v60, %v2797_v0 }
 0x30d   :  { %v774_v23 = vpack.c.bf16 %v762_v46, %v761_v45  ;;  %v753_v12 = vadd.f32 %v2834_v14, %v731_v11 }
 0x30e   :  { %v775_v25 = vpack.c.bf16 %v764_v9, %v763_v49  ;;  %v765_v52 = vmax.f32 %v749_v10, 0.0  ;;  %v766_v53 = vmax.f32 %v750_v51, 0.0  ;;  %v754_v57 = vadd.f32 %v2834_v14, %v732_v26 }
 0x30f   :  { %v769_v58 = vmax.f32 %v753_v12, 0.0 }
 0x310   :  { %v776_v55 = vpack.c.bf16 %v766_v53, %v765_v52  ;;  %v770_v61 = vmax.f32 %v754_v57, 0.0 }
 0x311   :  { %1014 = vmatmul.mubr.bf16.gmra.mrb[20].mxu0 %v772_v39  ;;  %1127 = vmatmul.mubr.bf16.gmra.mrb[20].mxu1 %v772_v39 }
 0x312   :  { %1023 = vmatprep.mubr.bf16.mxu0 %v2546_v3  ;;  %1136 = vmatprep.mubr.bf16.mxu1 %v2546_v3  ;;  %v778_v13 = vpack.c.bf16 %v770_v61, %v769_v58 }
 0x319   :  { %1024 = vmatmul.mubr.bf16.gmra.mrb[24].mxu0 %v773_v7  ;;  %1137 = vmatmul.mubr.bf16.gmra.mrb[24].mxu1 %v773_v7 }
 0x31a   :  { %1033 = vmatprep.mubr.bf16.mxu0 %v2546_v3  ;;  %1146 = vmatprep.mubr.bf16.mxu1 %v2546_v3 }
 0x321   :  { %1034 = vmatmul.mubr.bf16.gmra.mrb[28].mxu0 %v774_v23  ;;  %1147 = vmatmul.mubr.bf16.gmra.mrb[28].mxu1 %v774_v23 }
 0x322   :  { %1043 = vmatprep.mubr.bf16.mxu0 %v2546_v3  ;;  %1156 = vmatprep.mubr.bf16.mxu1 %v2546_v3 }
 0x329   :  { %1044 = vmatmul.mubr.bf16.gmra.mrb[32].mxu0 %v775_v25  ;;  %1157 = vmatmul.mubr.bf16.gmra.mrb[32].mxu1 %v775_v25 }
 0x32a   :  { %1053 = vmatprep.mubr.bf16.mxu0 %v2546_v3  ;;  %1166 = vmatprep.mubr.bf16.mxu1 %v2546_v3 }
 0x331   :  { %1054 = vmatmul.mubr.bf16.gmra.mrb[36].mxu0 %v776_v55  ;;  %1167 = vmatmul.mubr.bf16.gmra.mrb[36].mxu1 %v776_v55 }
 0x332   :  { %1063 = vmatprep.mubr.bf16.mxu0 %v2546_v3  ;;  %1176 = vmatprep.mubr.bf16.mxu1 %v2546_v3 }
 0x339   :  { %1064 = vmatmul.mubr.bf16.gmra.mrb[40].mxu0 %v777_v42  ;;  %1177 = vmatmul.mubr.bf16.gmra.mrb[40].mxu1 %v777_v42 }
 0x33a   :  { %1073 = vmatprep.mubr.bf16.mxu0 %v2546_v3  ;;  %1186 = vmatprep.mubr.bf16.mxu1 %v2546_v3 }
 0x341   :  { %1074 = vmatmul.mubr.bf16.gmra.mrb[44].mxu0 %v778_v13  ;;  %1187 = vmatmul.mubr.bf16.gmra.mrb[44].mxu1 %v778_v13 }
 0x3dc   :  { %v2895_v59 = vpop.f32.mrb[16].mxu0  ;;  %v2897_v27 = vpop.f32.mrb[16].mxu1 }
 0x3dd   :  { %v2899_v0 = vpop.f32.mrb[17].mxu0  ;;  %v2901_v60 = vpop.f32.mrb[17].mxu1 }
 0x3de   :  { %3955 = vst [vmem:[#allocation20_spill] sm:$0xff] %v2901_v60  ;;  %v2903_v14 = vpop.f32.mrb[18].mxu0  ;;  %v2905_v15 = vpop.f32.mrb[18].mxu1 }
 0x3df   :  { %v1199_v3 = vadd.f32 %v2903_v14, %v2895_v59  ;;  %v1241_v28 = vadd.f32 %v2905_v15, %v2897_v27  ;;  %v2911_v1 = vpop.f32.mrb[19].mxu0  ;;  %v2913_v29 = vpop.f32.mrb[19].mxu1 }
 0x3e0   :  { %3956 = vst [vmem:[#allocation21_spill] sm:$0xff] %v2913_v29  ;;  %v1220_v2 = vadd.f32 %v2911_v1, %v2899_v0  ;;  %v1262_v30 = vadd.f32 %v2913_v29, %v2901_v60 }
 0x3e4   :  { %v2919_v31 = vpop.f32.mrb[20].mxu0  ;;  %v2921_v4 = vpop.f32.mrb[20].mxu1 }
 0x3e5   :  { %v1200_v32 = vadd.f32 %v1199_v3, %v2919_v31  ;;  %v1242_v33 = vadd.f32 %v1241_v28, %v2921_v4  ;;  %v2925_v34 = vpop.f32.mrb[21].mxu0  ;;  %v2927_v63 = vpop.f32.mrb[21].mxu1 }
 0x3e6   :  { %3957 = vst [vmem:[#allocation22_spill] sm:$0xff] %v2927_v63  ;;  %v1221_v16 = vadd.f32 %v1220_v2, %v2925_v34  ;;  %v1263_v17 = vadd.f32 %v1262_v30, %v2927_v63  ;;  %v2931_v18 = vpop.f32.mrb[22].mxu0  ;;  %v2933_v19 = vpop.f32.mrb[22].mxu1 }
 0x3e7   :  { %v1201_v35 = vadd.f32 %v1200_v32, %v2931_v18  ;;  %v1243_v36 = vadd.f32 %v1242_v33, %v2933_v19  ;;  %v2937_v5 = vpop.f32.mrb[23].mxu0  ;;  %v2939_v37 = vpop.f32.mrb[23].mxu1 }
 0x3e8   :  { %3958 = vst [vmem:[#allocation23_spill] sm:$0xff] %v2939_v37  ;;  %v1222_v38 = vadd.f32 %v1221_v16, %v2937_v5  ;;  %v1264_v39 = vadd.f32 %v1263_v17, %v2939_v37 }
 0x3ec   :  { %v2943_v40 = vpop.f32.mrb[24].mxu0  ;;  %v2945_v41 = vpop.f32.mrb[24].mxu1 }
 0x3ed   :  { %v1202_v42 = vadd.f32 %v1201_v35, %v2943_v40  ;;  %v1244_v20 = vadd.f32 %v1243_v36, %v2945_v41  ;;  %v2949_v62 = vpop.f32.mrb[25].mxu0  ;;  %v2951_v21 = vpop.f32.mrb[25].mxu1 }
 0x3ee   :  { %3959 = vst [vmem:[#allocation24_spill] sm:$0xff] %v2951_v21  ;;  %v1223_v6 = vadd.f32 %v1222_v38, %v2949_v62  ;;  %v1265_v7 = vadd.f32 %v1264_v39, %v2951_v21  ;;  %v2955_v43 = vpop.f32.mrb[26].mxu0  ;;  %v2957_v44 = vpop.f32.mrb[26].mxu1 }
 0x3ef   :  { %v1203_v45 = vadd.f32 %v1202_v42, %v2955_v43  ;;  %v1245_v46 = vadd.f32 %v1244_v20, %v2957_v44  ;;  %v2961_v8 = vpop.f32.mrb[27].mxu0  ;;  %v2963_v22 = vpop.f32.mrb[27].mxu1 }
 0x3f0   :  { %3960 = vst [vmem:[#allocation25_spill] sm:$0xff] %v2961_v8  ;;  %3961 = vst [vmem:[#allocation26_spill] sm:$0xff] %v2963_v22  ;;  %v1224_v23 = vadd.f32 %v1223_v6, %v2961_v8  ;;  %v1266_v47 = vadd.f32 %v1265_v7, %v2963_v22 }
 0x3f4   :  { %v2967_v48 = vpop.f32.mrb[28].mxu0  ;;  %v2969_v49 = vpop.f32.mrb[28].mxu1 }
 0x3f5   :  { %v1204_v9 = vadd.f32 %v1203_v45, %v2967_v48  ;;  %v1246_v50 = vadd.f32 %v1245_v46, %v2969_v49  ;;  %v2973_v24 = vpop.f32.mrb[29].mxu0  ;;  %v2975_v25 = vpop.f32.mrb[29].mxu1 }
 0x3f6   :  { %3962 = vst [vmem:[#allocation27_spill] sm:$0xff] %v2973_v24  ;;  %3963 = vst [vmem:[#allocation28_spill] sm:$0xff] %v2975_v25  ;;  %v1225_v10 = vadd.f32 %v1224_v23, %v2973_v24  ;;  %v1267_v51 = vadd.f32 %v1266_v47, %v2975_v25  ;;  %v2979_v52 = vpop.f32.mrb[30].mxu0  ;;  %v2981_v53 = vpop.f32.mrb[30].mxu1 }
 0x3f7   :  { %v1205_v55 = vadd.f32 %v1204_v9, %v2979_v52  ;;  %v1247_v11 = vadd.f32 %v1246_v50, %v2981_v53  ;;  %v2985_v26 = vpop.f32.mrb[31].mxu0  ;;  %v2987_v12 = vpop.f32.mrb[31].mxu1 }
 0x3f8   :  { %3964 = vst [vmem:[#allocation29_spill] sm:$0xff] %v2985_v26  ;;  %3965 = vst [vmem:[#allocation30_spill] sm:$0xff] %v2987_v12  ;;  %v1226_v57 = vadd.f32 %v1225_v10, %v2985_v26  ;;  %v1268_v58 = vadd.f32 %v1267_v51, %v2987_v12 }
 0x3fc   :  { %v2991_v61 = vpop.f32.mrb[32].mxu0  ;;  %v2993_v13 = vpop.f32.mrb[32].mxu1 }
 0x3fd   :  { %v1206_v3 = vadd.f32 %v1205_v55, %v2991_v61  ;;  %v1248_v28 = vadd.f32 %v1247_v11, %v2993_v13  ;;  %v2997_v2 = vpop.f32.mrb[33].mxu0  ;;  %v2999_v30 = vpop.f32.mrb[33].mxu1 }
 0x3fe   :  { %3966 = vst [vmem:[#allocation31_spill] sm:$0xff] %v2997_v2  ;;  %3967 = vst [vmem:[#allocation32_spill] sm:$0xff] %v2999_v30  ;;  %v1227_v32 = vadd.f32 %v1226_v57, %v2997_v2  ;;  %v1269_v33 = vadd.f32 %v1268_v58, %v2999_v30  ;;  %v3003_v16 = vpop.f32.mrb[34].mxu0  ;;  %v3005_v17 = vpop.f32.mrb[34].mxu1 }
 0x3ff   :  { %v1207_v35 = vadd.f32 %v1206_v3, %v3003_v16  ;;  %v1249_v36 = vadd.f32 %v1248_v28, %v3005_v17  ;;  %v3009_v38 = vpop.f32.mrb[35].mxu0  ;;  %v3011_v39 = vpop.f32.mrb[35].mxu1 }
 0x400   :  { %3968 = vst [vmem:[#allocation33_spill] sm:$0xff] %v3009_v38  ;;  %3969 = vst [vmem:[#allocation34_spill] sm:$0xff] %v3011_v39  ;;  %v1228_v42 = vadd.f32 %v1227_v32, %v3009_v38  ;;  %v1270_v20 = vadd.f32 %v1269_v33, %v3011_v39 }
 0x404   :  { %v3015_v6 = vpop.f32.mrb[36].mxu0  ;;  %v3017_v7 = vpop.f32.mrb[36].mxu1 }
 0x405   :  { %v1208_v45 = vadd.f32 %v1207_v35, %v3015_v6  ;;  %v1250_v46 = vadd.f32 %v1249_v36, %v3017_v7  ;;  %v3021_v23 = vpop.f32.mrb[37].mxu0  ;;  %v3023_v47 = vpop.f32.mrb[37].mxu1 }
 0x406   :  { %3970 = vst [vmem:[#allocation35_spill] sm:$0xff] %v3021_v23  ;;  %3971 = vst [vmem:[#allocation36_spill] sm:$0xff] %v3023_v47  ;;  %v1229_v9 = vadd.f32 %v1228_v42, %v3021_v23  ;;  %v1271_v50 = vadd.f32 %v1270_v20, %v3023_v47  ;;  %v3027_v10 = vpop.f32.mrb[38].mxu0  ;;  %v3029_v51 = vpop.f32.mrb[38].mxu1 }
 0x407   :  { %v1209_v55 = vadd.f32 %v1208_v45, %v3027_v10  ;;  %v1251_v11 = vadd.f32 %v1250_v46, %v3029_v51  ;;  %v3033_v57 = vpop.f32.mrb[39].mxu0  ;;  %v3035_v58 = vpop.f32.mrb[39].mxu1 }
 0x408   :  { %3972 = vst [vmem:[#allocation37_spill] sm:$0xff] %v3033_v57  ;;  %3973 = vst [vmem:[#allocation38_spill] sm:$0xff] %v3035_v58  ;;  %v1230_v3 = vadd.f32 %v1229_v9, %v3033_v57  ;;  %v1272_v28 = vadd.f32 %v1271_v50, %v3035_v58 }
 0x40c   :  { %v3039_v32 = vpop.f32.mrb[40].mxu0  ;;  %v3041_v33 = vpop.f32.mrb[40].mxu1 }
 0x40d   :  { %v1210_v35 = vadd.f32 %v1209_v55, %v3039_v32  ;;  %v1252_v36 = vadd.f32 %v1251_v11, %v3041_v33  ;;  %v3045_v42 = vpop.f32.mrb[41].mxu0  ;;  %v3047_v20 = vpop.f32.mrb[41].mxu1 }
 0x40e   :  { %3974 = vst [vmem:[#allocation39_spill] sm:$0xff] %v3045_v42  ;;  %3975 = vst [vmem:[#allocation40_spill] sm:$0xff] %v3047_v20  ;;  %v1231_v45 = vadd.f32 %v1230_v3, %v3045_v42  ;;  %v1273_v46 = vadd.f32 %v1272_v28, %v3047_v20  ;;  %v1069_v56 = vpop.f32.mrb[42].mxu0  ;;  %v3051_v9 = vpop.f32.mrb[42].mxu1 }
 0x40f   :  { %v1211_v50 = vadd.f32 %v1210_v35, %v1069_v56  ;;  %v1253_v54 = vadd.f32 %v1252_v36, %v3051_v9  ;;  %v3054_v58 = vpop.f32.mrb[43].mxu0  ;;  %v3056_v47 = vpop.f32.mrb[43].mxu1 }
 0x410   :  { %3976 = vst [vmem:[#allocation41_spill] sm:$0xff] %v3054_v58  ;;  %3977 = vst [vmem:[#allocation42_spill] sm:$0xff] %v3056_v47  ;;  %v1232_v55 = vadd.f32 %v1231_v45, %v3054_v58  ;;  %v1274_v11 = vadd.f32 %v1273_v46, %v3056_v47 }
 0x414   :  { %v1075_v39 = vpop.f32.mrb[44].mxu0  ;;  %v3060_v30 = vpop.f32.mrb[44].mxu1 }
 0x415   :  { %v1212_v3 = vadd.f32 %v1211_v50, %v1075_v39  ;;  %v1254_v28 = vadd.f32 %v1253_v54, %v3060_v30  ;;  %v3063_v20 = vpop.f32.mrb[45].mxu0  ;;  %v3065_v12 = vpop.f32.mrb[45].mxu1 }
 0x416   :  { %3978 = vst [vmem:[#allocation43_spill] sm:$0xff] %v3063_v20  ;;  %3979 = vst [vmem:[#allocation44_spill] sm:$0xff] %v3065_v12  ;;  %v1233_v35 = vadd.f32 %v1232_v55, %v3063_v20  ;;  %v1275_v36 = vadd.f32 %v1274_v11, %v3065_v12  ;;  %v1079_v25 = vpop.f32.mrb[46].mxu0  ;;  %v3069_v22 = vpop.f32.mrb[46].mxu1 }
 0x417   :  { %v1213_v45 = vadd.f32 %v1212_v3, %v1079_v25  ;;  %v1255_v46 = vadd.f32 %v1254_v28, %v3069_v22  ;;  %v3072_v47 = vpop.f32.mrb[47].mxu0  ;;  %v3074_v21 = vpop.f32.mrb[47].mxu1 }
 0x418   :  { %3980 = vst [vmem:[#allocation45_spill] sm:$0xff] %v3072_v47  ;;  %3981 = vst [vmem:[#allocation46_spill] sm:$0xff] %v3074_v21  ;;  %v1234_v54 = vadd.f32 %v1233_v35, %v3072_v47  ;;  %v1276_v50 = vadd.f32 %v1275_v36, %v3074_v21 }
 0x419   :  { %v1214_v37 = vrot.slane %v1213_v45, 4  ;;  %v1256_v63 = vrot.slane %v1255_v46, 4 }
 0x41a   :  { %v1235_v29 = vrot.slane %v1234_v54, 4  ;;  %v1277_v55 = vrot.slane %v1276_v50, 4 }
 0x41b   :  { %v1215_v60 = vadd.f32 %v1214_v37, %v1213_v45  ;;  %v1257_v11 = vadd.f32 %v1256_v63, %v1255_v46 }
 0x41c   :  { %v1236_v12 = vadd.f32 %v1235_v29, %v1234_v54  ;;  %v1278_v20 = vadd.f32 %v1277_v55, %v1276_v50 }
 0x41d   :  { %v1216_v58 = vrot.slane %v1215_v60, 2  ;;  %v1258_v3 = vrot.slane %v1257_v11, 2 }
 0x41e   :  { %v1237_v42 = vrot.slane %v1236_v12, 2  ;;  %v1279_v28 = vrot.slane %v1278_v20, 2 }
 0x41f   :  { %v1217_v57 = vadd.f32 %v1216_v58, %v1215_v60  ;;  %v1259_v23 = vadd.f32 %v1258_v3, %v1257_v11 }
 0x420   :  { %v1238_v26 = vadd.f32 %v1237_v42, %v1236_v12  ;;  %v1280_v35 = vadd.f32 %v1279_v28, %v1278_v20 }
 0x421   :  { %v1218_v38 = vrot.slane %v1217_v57, 1  ;;  %v1260_v2 = vrot.slane %v1259_v23, 1 }
 0x422   :  { %v1239_v24 = vrot.slane %v1238_v26, 1  ;;  %v1281_v8 = vrot.slane %v1280_v35, 1 }
 0x423   :  { %v1219_v47 = vadd.f32 %v1218_v38, %v1217_v57  ;;  %v1261_v21 = vadd.f32 %v1260_v2, %v1259_v23 }
 0x424   :  { %v1240_v57 = vadd.f32 %v1239_v24, %v1238_v26 }
 0x425   :  { %v1283_v36 = vmul.f32 0.0078125, %v1219_v47 }
 0x427   :  { %v3079_v37 = vsub.f32 %v2895_v59, %v1283_v36  ;;  %v3082_v29 = vsub.f32 %v2903_v14, %v1283_v36  ;;  %v3085_v63 = vsub.f32 %v2919_v31, %v1283_v36  ;;  %v3088_v60 = vsub.f32 %v2931_v18, %v1283_v36 }
 0x428   :  { %v3091_v12 = vsub.f32 %v2943_v40, %v1283_v36  ;;  %v3094_v38 = vsub.f32 %v2955_v43, %v1283_v36  ;;  %v3097_v2 = vsub.f32 %v2967_v48, %v1283_v36  ;;  %v3100_v59 = vsub.f32 %v2979_v52, %v1283_v36 }
 0x429   :  { %v3103_v14 = vsub.f32 %v2991_v61, %v1283_v36  ;;  %v3106_v31 = vsub.f32 %v3003_v16, %v1283_v36  ;;  %v3109_v18 = vsub.f32 %v3015_v6, %v1283_v36  ;;  %v3112_v40 = vsub.f32 %v3027_v10, %v1283_v36 }
 0x42a   :  { %v3115_v43 = vsub.f32 %v3039_v32, %v1283_v36  ;;  %v3117_v48 = vsub.f32 %v1069_v56, %v1283_v36  ;;  %v3119_v23 = vsub.f32 %v1075_v39, %v1283_v36  ;;  %v3121_v52 = vsub.f32 %v1079_v25, %v1283_v36 }
 0x42b   :  { %3982 = vst [vmem:[#allocation47_spill] sm:$0xff] %v3106_v31  ;;  %3983 = vst [vmem:[#allocation48_spill] sm:$0xff] %v3109_v18  ;;  %v1351_v61 = vmul.f32 %v3079_v37, %v3079_v37  ;;  %v1355_v16 = vmul.f32 %v3082_v29, %v3082_v29  ;;  %v1285_v6 = vmul.f32 0.0078125, %v1261_v21  ;;  %v1359_v47 = vmul.f32 %v3085_v63, %v3085_v63 }
 0x42c   :  { %3984 = vst [vmem:[#allocation49_spill] sm:$0xff] %v3112_v40  ;;  %3985 = vst [vmem:[#allocation50_spill] sm:$0xff] %v3115_v43  ;;  %v1363_v10 = vmul.f32 %v3088_v60, %v3088_v60  ;;  %v1282_v56 = vadd.f32 %v1281_v8, %v1280_v35  ;;  %v1383_v54 = vmul.f32 %v3103_v14, %v3103_v14 }
 0x42d   :  { %3986 = vst [vmem:[#allocation51_spill] sm:$0xff] %v3117_v48  ;;  %3987 = vst [vmem:[#allocation52_spill] sm:$0xff] %v3119_v23  ;;  %v1415_v58 = vadd.f32 %v1355_v16, %v1351_v61  ;;  %v3132_v39 = vsub.f32 %v2897_v27, %v1285_v6  ;;  %v3135_v25 = vsub.f32 %v2905_v15, %v1285_v6 }
 0x42e   :  { %3988 = vst [vmem:[#allocation53_spill] sm:$0xff] %v3121_v52  ;;  %v3138_v32 = vsub.f32 %v2921_v4, %v1285_v6  ;;  %v3141_v21 = vsub.f32 %v2933_v19, %v1285_v6  ;;  %v3144_v42 = vsub.f32 %v2945_v41, %v1285_v6  ;;  %v3147_v20 = vsub.f32 %v2957_v44, %v1285_v6 }
 0x42f   :  { %3989 = vst [vmem:[#allocation54_spill] sm:$0xff] %v3132_v39  ;;  %3990 = vst [vmem:[#allocation55_spill] sm:$0xff] %v3135_v25  ;;  %v3150_v8 = vsub.f32 %v2969_v49, %v1285_v6  ;;  %v1416_v27 = vadd.f32 %v1415_v58, %v1359_v47  ;;  %v3153_v24 = vsub.f32 %v2981_v53, %v1285_v6  ;;  %v3187_v46 = vmul.f32 0.0078125, %v1282_v56  ;;  %v4004_v58 = vld [vmem:[#allocation25_spill] sm:$0xff] }
 0x430   :  { %3991 = vst [vmem:[#allocation56_spill] sm:$0xff] %v3138_v32  ;;  %3992 = vst [vmem:[#allocation57_spill] sm:$0xff] %v3141_v21  ;;  %v3156_v15 = vsub.f32 %v2993_v13, %v1285_v6  ;;  %v3159_v4 = vsub.f32 %v3005_v17, %v1285_v6  ;;  %v3162_v19 = vsub.f32 %v3017_v7, %v1285_v6 }
 0x431   :  { %3993 = vst [vmem:[#allocation58_spill] sm:$0xff] %v3144_v42  ;;  %3994 = vst [vmem:[#allocation59_spill] sm:$0xff] %v3147_v20  ;;  %v3165_v41 = vsub.f32 %v3029_v51, %v1285_v6  ;;  %v3168_v44 = vsub.f32 %v3041_v33, %v1285_v6  ;;  %v3171_v49 = vsub.f32 %v3051_v9, %v1285_v6  ;;  %v1284_v33 = vmul.f32 0.0078125, %v1240_v57 }
 0x432   :  { %3995 = vst [vmem:[#allocation60_spill] sm:$0xff] %v3150_v8  ;;  %3996 = vst [vmem:[#allocation61_spill] sm:$0xff] %v3153_v24  ;;  %v1367_v53 = vmul.f32 %v3091_v12, %v3091_v12  ;;  %v1417_v26 = vadd.f32 %v1416_v27, %v1363_v10  ;;  %v3176_v13 = vsub.f32 %v3060_v30, %v1285_v6 }
 0x433   :  { %3997 = vst [vmem:[#allocation62_spill] sm:$0xff] %v3156_v15  ;;  %3998 = vst [vmem:[#allocation63_spill] sm:$0xff] %v3159_v4  ;;  %v3179_v17 = vsub.f32 %v3069_v22, %v1285_v6  ;;  %v1353_v7 = vmul.f32 %v3132_v39, %v3132_v39  ;;  %v1357_v51 = vmul.f32 %v3135_v25, %v3135_v25 }
 0x434   :  { %3999 = vst [vmem:[#allocation64_spill] sm:$0xff] %v3162_v19  ;;  %4000 = vst [vmem:[#allocation65_spill] sm:$0xff] %v3168_v44  ;;  %v1371_v9 = vmul.f32 %v3094_v38, %v3094_v38  ;;  %v1418_v45 = vadd.f32 %v1417_v26, %v1367_v53  ;;  %v1375_v30 = vmul.f32 %v3097_v2, %v3097_v2  ;;  %v4005_v53 = vld [vmem:[#allocation27_spill] sm:$0xff]  ;;  %v4006_v26 = vld [vmem:[#allocation29_spill] sm:$0xff] }
 0x435   :  { %4001 = vst [vmem:[#allocation66_spill] sm:$0xff] %v3171_v49  ;;  %4002 = vst [vmem:[#allocation67_spill] sm:$0xff] %v3176_v13  ;;  %v1379_v22 = vmul.f32 %v3100_v59, %v3100_v59  ;;  %v1387_v50 = vmul.f32 %v3106_v31, %v3106_v31  ;;  %v1391_v55 = vmul.f32 %v3109_v18, %v3109_v18 }
 0x436   :  { %4003 = vst [vmem:[#allocation68_spill] sm:$0xff] %v3179_v17  ;;  %v1419_v11 = vadd.f32 %v1418_v45, %v1371_v9  ;;  %v1361_v3 = vmul.f32 %v3138_v32, %v3138_v32  ;;  %v1365_v28 = vmul.f32 %v3141_v21, %v3141_v21  ;;  %v1369_v35 = vmul.f32 %v3144_v42, %v3144_v42  ;;  %v4008_v9 = vld [vmem:[#allocation33_spill] sm:$0xff]  ;;  %v4009_v45 = vld [vmem:[#allocation35_spill] sm:$0xff] }
 0x437   :  { %v1457_v36 = vadd.f32 %v1357_v51, %v1353_v7  ;;  %v3206_v61 = vsub.f32 %v2899_v0, %v1284_v33  ;;  %v3209_v16 = vsub.f32 %v2911_v1, %v1284_v33  ;;  %v3212_v47 = vsub.f32 %v2925_v34, %v1284_v33  ;;  %v4007_v51 = vld [vmem:[#allocation31_spill] sm:$0xff]  ;;  %v4014_v42 = vld [vmem:[#allocation45_spill] sm:$0xff] }
 0x438   :  { %v1420_v6 = vadd.f32 %v1419_v11, %v1375_v30  ;;  %v3215_v10 = vsub.f32 %v2937_v5, %v1284_v33  ;;  %v3218_v57 = vsub.f32 %v2949_v62, %v1284_v33  ;;  %v3221_v27 = vsub.f32 %v4004_v58, %v1284_v33  ;;  %v4010_v11 = vld [vmem:[#allocation37_spill] sm:$0xff]  ;;  %v4018_v32 = vld [vmem:[#allocation23_spill] sm:$0xff] }
 0x439   :  { %v1458_v56 = vadd.f32 %v1457_v36, %v1361_v3  ;;  %v3224_v0 = vsub.f32 %v4005_v53, %v1284_v33  ;;  %v3227_v1 = vsub.f32 %v4006_v26, %v1284_v33  ;;  %v3230_v34 = vsub.f32 %v4007_v51, %v1284_v33  ;;  %v4011_v36 = vld [vmem:[#allocation39_spill] sm:$0xff]  ;;  %v4012_v53 = vld [vmem:[#allocation41_spill] sm:$0xff] }
 0x43a   :  { %v1421_v7 = vadd.f32 %v1420_v6, %v1379_v22  ;;  %v3233_v5 = vsub.f32 %v4008_v9, %v1284_v33  ;;  %v3236_v62 = vsub.f32 %v4009_v45, %v1284_v33  ;;  %v3239_v3 = vsub.f32 %v4010_v11, %v1284_v33  ;;  %v4013_v51 = vld [vmem:[#allocation43_spill] sm:$0xff] }
 0x43b   :  { %v1459_v30 = vadd.f32 %v1458_v56, %v1365_v28  ;;  %v3242_v58 = vsub.f32 %v4011_v36, %v1284_v33  ;;  %v3245_v26 = vsub.f32 %v4012_v53, %v1284_v33  ;;  %v1395_v22 = vmul.f32 %v3112_v40, %v3112_v40 }
 0x43c   :  { %v1422_v6 = vadd.f32 %v1421_v7, %v1383_v54  ;;  %v3250_v9 = vsub.f32 %v4013_v51, %v1284_v33  ;;  %v3253_v45 = vsub.f32 %v4014_v42, %v1284_v33  ;;  %v1399_v28 = vmul.f32 %v3115_v43, %v3115_v43 }
 0x43d   :  { %v1403_v56 = vmul.f32 %v3117_v48, %v3117_v48  ;;  %v1373_v11 = vmul.f32 %v3147_v20, %v3147_v20  ;;  %v1460_v36 = vadd.f32 %v1459_v30, %v1369_v35  ;;  %v1407_v53 = vmul.f32 %v3119_v23, %v3119_v23 }
 0x43e   :  { %v1423_v54 = vadd.f32 %v1422_v6, %v1387_v50  ;;  %v1352_v7 = vmul.f32 %v3206_v61, %v3206_v61  ;;  %v1356_v42 = vmul.f32 %v3209_v16, %v3209_v16  ;;  %v1411_v33 = vmul.f32 %v3121_v52, %v3121_v52 }
 0x43f   :  { %v1377_v51 = vmul.f32 %v3150_v8, %v3150_v8  ;;  %v1381_v20 = vmul.f32 %v3153_v24, %v3153_v24  ;;  %v1461_v35 = vadd.f32 %v1460_v36, %v1373_v11  ;;  %v1385_v50 = vmul.f32 %v3156_v15, %v3156_v15 }
 0x440   :  { %v1424_v30 = vadd.f32 %v1423_v54, %v1391_v55  ;;  %v1389_v6 = vmul.f32 %v3159_v4, %v3159_v4  ;;  %v1393_v25 = vmul.f32 %v3162_v19, %v3162_v19  ;;  %v1360_v39 = vmul.f32 %v3212_v47, %v3212_v47  ;;  %v4015_v54 = vld [vmem:[#allocation20_spill] sm:$0xff]  ;;  %v4016_v4 = vld [vmem:[#allocation21_spill] sm:$0xff] }
 0x441   :  { %v1462_v21 = vadd.f32 %v1461_v35, %v1377_v51  ;;  %v1364_v8 = vmul.f32 %v3215_v10, %v3215_v10  ;;  %v1368_v11 = vmul.f32 %v3218_v57, %v3218_v57  ;;  %v1436_v36 = vadd.f32 %v1356_v42, %v1352_v7  ;;  %v4017_v35 = vld [vmem:[#allocation22_spill] sm:$0xff] }
 0x442   :  { %v1425_v55 = vadd.f32 %v1424_v30, %v1395_v22  ;;  %v3287_v15 = vsub.f32 %v4015_v54, %v3187_v46  ;;  %v3291_v24 = vsub.f32 %v4016_v4, %v3187_v46  ;;  %v3295_v19 = vsub.f32 %v4017_v35, %v3187_v46  ;;  %v4019_v22 = vld [vmem:[#allocation24_spill] sm:$0xff]  ;;  %v4020_v54 = vld [vmem:[#allocation26_spill] sm:$0xff] }
 0x443   :  { %v1463_v51 = vadd.f32 %v1462_v21, %v1381_v20  ;;  %v3299_v52 = vsub.f32 %v4018_v32, %v3187_v46  ;;  %v3303_v7 = vsub.f32 %v4019_v22, %v3187_v46  ;;  %v1437_v30 = vadd.f32 %v1436_v36, %v1360_v39  ;;  %v4021_v21 = vld [vmem:[#allocation28_spill] sm:$0xff]  ;;  %v4022_v35 = vld [vmem:[#allocation30_spill] sm:$0xff] }
 0x444   :  { %v1426_v42 = vadd.f32 %v1425_v55, %v1399_v28  ;;  %v3307_v23 = vsub.f32 %v4020_v54, %v3187_v46  ;;  %v3311_v20 = vsub.f32 %v4021_v21, %v3187_v46  ;;  %v3315_v48 = vsub.f32 %v4022_v35, %v3187_v46  ;;  %v4023_v32 = vld [vmem:[#allocation32_spill] sm:$0xff]  ;;  %v4024_v28 = vld [vmem:[#allocation34_spill] sm:$0xff] }
 0x445   :  { %v1464_v4 = vadd.f32 %v1463_v51, %v1385_v50  ;;  %v3319_v43 = vsub.f32 %v4023_v32, %v3187_v46  ;;  %v3323_v39 = vsub.f32 %v4024_v28, %v3187_v46  ;;  %v1438_v36 = vadd.f32 %v1437_v30, %v1364_v8  ;;  %v4025_v22 = vld [vmem:[#allocation36_spill] sm:$0xff]  ;;  %v4027_v50 = vld [vmem:[#allocation38_spill] sm:$0xff] }
 0x446   :  { %v1427_v55 = vadd.f32 %v1426_v42, %v1403_v56  ;;  %v3327_v54 = vsub.f32 %v4025_v22, %v3187_v46  ;;  %v3331_v51 = vsub.f32 %v4027_v50, %v3187_v46  ;;  %v4028_v35 = vld [vmem:[#allocation40_spill] sm:$0xff]  ;;  %v4030_v32 = vld [vmem:[#allocation42_spill] sm:$0xff]  ;;  %v1372_v30 = vmul.f32 %v3221_v27, %v3221_v27 }
 0x447   :  { %v1465_v21 = vadd.f32 %v1464_v4, %v1389_v6  ;;  %v3335_v40 = vsub.f32 %v4028_v35, %v3187_v46  ;;  %v3339_v18 = vsub.f32 %v4030_v32, %v3187_v46  ;;  %v4032_v56 = vld [vmem:[#allocation44_spill] sm:$0xff]  ;;  %v1439_v28 = vadd.f32 %v1438_v36, %v1368_v11  ;;  %v4034_v22 = vld [vmem:[#allocation46_spill] sm:$0xff] }
 0x448   :  { %4026 = vst [vmem:[#allocation25_spill] sm:$0xff] %v3327_v54  ;;  %v3343_v8 = vsub.f32 %v4032_v56, %v3187_v46  ;;  %v1428_v42 = vadd.f32 %v1427_v55, %v1407_v53  ;;  %v3349_v6 = vsub.f32 %v4034_v22, %v3187_v46  ;;  %v1397_v4 = vmul.f32 %v3165_v41, %v3165_v41 }
 0x449   :  { %4029 = vst [vmem:[#allocation27_spill] sm:$0xff] %v3335_v40  ;;  %4031 = vst [vmem:[#allocation29_spill] sm:$0xff] %v3339_v18  ;;  %v1466_v50 = vadd.f32 %v1465_v21, %v1393_v25  ;;  %v1376_v32 = vmul.f32 %v3224_v0, %v3224_v0  ;;  %v1440_v31 = vadd.f32 %v1439_v28, %v1372_v30 }
 0x44a   :  { %4033 = vst [vmem:[#allocation31_spill] sm:$0xff] %v3343_v8  ;;  %4035 = vst [vmem:[#allocation33_spill] sm:$0xff] %v3349_v6  ;;  %v1429_v35 = vadd.f32 %v1428_v42, %v1411_v33  ;;  %v1401_v53 = vmul.f32 %v3168_v44, %v3168_v44  ;;  %v1354_v11 = vmul.f32 %v3287_v15, %v3287_v15 }
 0x44b   :  { %v1467_v55 = vadd.f32 %v1466_v50, %v1397_v4  ;;  %v1358_v46 = vmul.f32 %v3291_v24, %v3291_v24  ;;  %v1380_v36 = vmul.f32 %v3227_v1, %v3227_v1  ;;  %v1441_v56 = vadd.f32 %v1440_v31, %v1376_v32 }
 0x44c   :  { %v1405_v25 = vmul.f32 %v3171_v49, %v3171_v49  ;;  %v1430_v21 = vrot.slane %v1429_v35, 4  ;;  %v1384_v42 = vmul.f32 %v3230_v34, %v3230_v34  ;;  %v1362_v22 = vmul.f32 %v3295_v19, %v3295_v19 }
 0x44d   :  { %v1468_v33 = vadd.f32 %v1467_v55, %v1401_v53  ;;  %v1442_v30 = vadd.f32 %v1441_v56, %v1380_v36  ;;  %v1478_v4 = vadd.f32 %v1358_v46, %v1354_v11  ;;  %v1388_v50 = vmul.f32 %v3233_v5, %v3233_v5 }
 0x44e   :  { %v1409_v31 = vmul.f32 %v3176_v13, %v3176_v13  ;;  %v1366_v32 = vmul.f32 %v3299_v52, %v3299_v52  ;;  %v1431_v55 = vadd.f32 %v1430_v21, %v1429_v35  ;;  %v1392_v36 = vmul.f32 %v3236_v62, %v3236_v62 }
 0x44f   :  { %v1469_v28 = vadd.f32 %v1468_v33, %v1405_v25  ;;  %v1443_v44 = vadd.f32 %v1442_v30, %v1384_v42  ;;  %v1479_v53 = vadd.f32 %v1478_v4, %v1362_v22  ;;  %v1370_v11 = vmul.f32 %v3303_v7, %v3303_v7 }
 0x450   :  { %v1396_v33 = vmul.f32 %v3239_v3, %v3239_v3  ;;  %v1413_v30 = vmul.f32 %v3179_v17, %v3179_v17  ;;  %v1374_v22 = vmul.f32 %v3307_v23, %v3307_v23  ;;  %v1432_v21 = vrot.slane %v1431_v55, 2 }
 0x451   :  { %v1444_v56 = vadd.f32 %v1443_v44, %v1388_v50  ;;  %v1470_v25 = vadd.f32 %v1469_v28, %v1409_v31  ;;  %v1480_v46 = vadd.f32 %v1479_v53, %v1366_v32  ;;  %v1400_v44 = vmul.f32 %v3242_v58, %v3242_v58 }
 0x452   :  { %v1378_v50 = vmul.f32 %v3311_v20, %v3311_v20  ;;  %v1404_v32 = vmul.f32 %v3245_v26, %v3245_v26  ;;  %v1433_v13 = vadd.f32 %v1432_v21, %v1431_v55  ;;  %v1394_v21 = vmul.f32 %v3327_v54, %v3327_v54 }
 0x453   :  { %v1445_v42 = vadd.f32 %v1444_v56, %v1392_v36  ;;  %v1481_v35 = vadd.f32 %v1480_v46, %v1370_v11  ;;  %v1471_v4 = vadd.f32 %v1470_v25, %v1413_v30  ;;  %v1382_v36 = vmul.f32 %v3315_v48, %v3315_v48 }
 0x454   :  { %v1408_v11 = vmul.f32 %v3250_v9, %v3250_v9  ;;  %v1386_v25 = vmul.f32 %v3319_v43, %v3319_v43 }
 0x455   :  { %v1446_v28 = vadd.f32 %v1445_v42, %v1396_v33  ;;  %v1482_v31 = vadd.f32 %v1481_v35, %v1374_v22  ;;  %v1472_v17 = vrot.slane %v1471_v4, 4  ;;  %v1412_v42 = vmul.f32 %v3253_v45, %v3253_v45 }
 0x456   :  { %v1390_v22 = vmul.f32 %v3323_v39, %v3323_v39 }
 0x457   :  { %v1447_v53 = vadd.f32 %v1446_v28, %v1400_v44  ;;  %v1483_v56 = vadd.f32 %v1482_v31, %v1378_v50  ;;  %v1434_v44 = vrot.slane %v1433_v13, 1  ;;  %v1473_v55 = vadd.f32 %v1472_v17, %v1471_v4 }
 0x458   :  { %v1406_v17 = vmul.f32 %v3339_v18, %v3339_v18  ;;  %v4044_v18 = vld [vmem:[#allocation53_spill] sm:$0xff] }
 0x459   :  { %v1448_v46 = vadd.f32 %v1447_v53, %v1404_v32  ;;  %v1484_v33 = vadd.f32 %v1483_v56, %v1382_v36  ;;  %v1398_v32 = vmul.f32 %v3331_v51, %v3331_v51  ;;  %v1435_v36 = vadd.f32 %v1434_v44, %v1433_v13 }
 0x45a   :  { %v1474_v49 = vrot.slane %v1473_v55, 2  ;;  %v1414_v13 = vmul.f32 %v3349_v6, %v3349_v6 }
 0x45b   :  { %v1449_v30 = vadd.f32 %v1448_v46, %v1408_v11  ;;  %v1485_v35 = vadd.f32 %v1484_v33, %v1386_v25  ;;  %v1402_v11 = vmul.f32 %v3335_v40, %v3335_v40  ;;  %v1499_v33 = vmul.f32 0.0078125, %v1435_v36 }
 0x45d   :  { %v1450_v28 = vadd.f32 %v1449_v30, %v1412_v42  ;;  %v1486_v50 = vadd.f32 %v1485_v35, %v1390_v22  ;;  %v1475_v30 = vadd.f32 %v1474_v49, %v1473_v55  ;;  %v1410_v22 = vmul.f32 %v3343_v8, %v3343_v8 }
 0x45f   :  { %v1451_v31 = vrot.slane %v1450_v28, 4  ;;  %v1487_v53 = vadd.f32 %v1486_v50, %v1394_v21 }
 0x461   :  { %v1452_v56 = vadd.f32 %v1451_v31, %v1450_v28  ;;  %v1488_v46 = vadd.f32 %v1487_v53, %v1398_v32  ;;  %v1503_v28 = vadd.f32 1e-05, %v1499_v33  ;;  %v1476_v31 = vrot.slane %v1475_v30, 1 }
 0x463   :  { %v1453_v25 = vrot.slane %v1452_v56, 2  ;;  %v1489_v4 = vadd.f32 %v1488_v46, %v1402_v11  ;;  %2292 = vrsqrt.f32 %v1503_v28  ;;  %v1477_v36 = vadd.f32 %v1476_v31, %v1475_v30 }
 0x465   :  { %v1454_v42 = vadd.f32 %v1453_v25, %v1452_v56  ;;  %v1490_v35 = vadd.f32 %v1489_v4, %v1406_v17  ;;  %v1501_v55 = vmul.f32 0.0078125, %v1477_v36 }
 0x467   :  { %v1455_v21 = vrot.slane %v1454_v42, 1  ;;  %v1491_v44 = vadd.f32 %v1490_v35, %v1410_v22  ;;  %v1505_v17 = vadd.f32 1e-05, %v1501_v55  ;;  %v2547_v35 = vmov 1966171168  }
 0x469   :  { %v1456_v50 = vadd.f32 %v1455_v21, %v1454_v42  ;;  %v1492_v32 = vadd.f32 %v1491_v44, %v1414_v13  ;;  %v1518_v21 = vunpack.c.l.s4 %v2547_v35  ;;  %v4036_v44 = vld [vmem:[#allocation18_spill] sm:$0xff] }
 0x46a   :  { %v1556_v55 = vsub.s32 3, %v4036_v44 }
 0x46b   :  { %v1500_v53 = vmul.f32 0.0078125, %v1456_v50  ;;  %v1493_v40 = vrot.slane %v1492_v32, 4  ;;  %v1519_v13 = vunpack.c.0.s8 %v1518_v21 }
 0x46d   :  { %v1504_v11 = vadd.f32 1e-05, %v1500_v53  ;;  %v1494_v56 = vadd.f32 %v1493_v40, %v1492_v32  ;;  %v2293_v8 = vpop.eup %2292  ;;  %v1522_v30 = vsub.s32 %v1519_v13, %v4036_v44 }
 0x46f   :  { %2294 = vrsqrt.f32 %v1504_v11  ;;  %v1495_v49 = vrot.slane %v1494_v56, 2  ;;  %v1197_v11 = vld [vmem:[%s3891_s8] sm:$0xf]  ;;  %s2548_s8 = smov [#allocation10]  }
 0x470   :  { %2296 = vrsqrt.f32 %v1505_v17 }
 0x471   :  { %v1496_v46 = vadd.f32 %v1495_v49, %v1494_v56  ;;  %v1552_v56 = vsub.s32 2, %v4036_v44 }
 0x473   :  { %v1497_v25 = vrot.slane %v1496_v46, 1 }
 0x475   :  { %v1498_v4 = vadd.f32 %v1497_v25, %v1496_v46  ;;  %v4037_v46 = vld [vmem:[#allocation19_spill] sm:$0xff] }
 0x477   :  { %v1502_v6 = vmul.f32 0.0078125, %v1498_v4 }
 0x479   :  { %v2295_v22 = vpop.eup %2294  ;;  %v1506_v42 = vadd.f32 1e-05, %v1502_v6  ;;  %v1198_v6 = vld [vmem:[%s3892_s9] sm:$0xf]  ;;  %s2020_s9 = sshll.u32 %s2548_s8, 4  ;;  %s2021_s9 = int_to_ptr.vmem [resolvable:$true] %s2020_s9 }
 0x47a   :  { %v1515_v33 = vcombine.low %v2293_v8, %v2295_v22  ;;  %v2297_v40 = vpop.eup %2296  ;;  %v1548_v8 = vsub.s32 1, %v4036_v44  ;;  %v3424_v25 = vrot.slane %v1198_v6, %v4037_v46  ;;  %v3433_v35 = vrot.slane %v1198_v6, %v1556_v55  ;;  %s2484_s0 = scalar_lea.vmem %s2021_s9, 4096  ;;  %p2489_p5 = scmp.lt.s32.totalorder %s2021_s9, %s2021_s9 }
 0x47b   :  { %2298 = vrsqrt.f32 %v1506_v42  ;;  %v3431_v42 = vrot.slane %v1198_v6, %v1552_v56  ;;  %p2485_p4 = scmp.ne.s32.totalorder %s2021_s9, %s2484_s0  ;;  %p2490_p6 = scmp.lt.s32.totalorder %s2484_s0, %s2484_s0 }
 0x47c   :  { %v1523_v50 = vrot.slane %v1515_v33, %v1522_v30  ;;  %v3429_v33 = vrot.slane %v1198_v6, %v1548_v8  ;;  %v4041_v6 = vld [vmem:[#allocation50_spill] sm:$0xff] }
 0x47d   :  { %p2491_p7 = por %p2490_p6, %p2489_p5 }
 0x47f   :  { %p2492_p8 = pnand %p2491_p7, %p2485_p4 }
 0x485   :  { %v2299_v28 = vpop.eup %2298 }
 0x486   :  { %v1516_v31 = vcombine.low %v2297_v40, %v2299_v28 }
 0x488   :  { %v1530_v32 = vrot.slane %v1516_v31, %v1522_v30 }
 0x48a   :  { %v1531_v53 = vcombine.low %v1523_v50, %v1530_v32 }
 0x48c   :  { %v1538_v36 = vrot.slane %v1531_v53, %v1522_v30 }
 0x48e   :  { %v1540_v49 = vmul.f32 %v1538_v36, %v1197_v11  ;;  %v4038_v11 = vld [vmem:[#allocation47_spill] sm:$0xff]  ;;  %v4039_v36 = vld [vmem:[#allocation48_spill] sm:$0xff] }
 0x490   :  { %v1545_v17 = vrot.slane %v1540_v49, %v4037_v46  ;;  %v1549_v4 = vrot.slane %v1540_v49, %v1548_v8  ;;  %v3427_v22 = vrot.slane %v1540_v49, %v1552_v56  ;;  %v4040_v8 = vld [vmem:[#allocation49_spill] sm:$0xff]  ;;  %v4042_v56 = vld [vmem:[#allocation51_spill] sm:$0xff]  ;;  %v4043_v46 = vld [vmem:[#allocation52_spill] sm:$0xff]  ;;  %v3467_v54 = vrot.slane %v1540_v49, %v1556_v55 }
 0x492   :  { %v1562_v21 = vmul.f32 %v1545_v17, %v3079_v37  ;;  %v1563_v13 = vmul.f32 %v1549_v4, %v3206_v61  ;;  %v1566_v44 = vmul.f32 %v1545_v17, %v3082_v29  ;;  %v1567_v30 = vmul.f32 %v1549_v4, %v3209_v16 }
 0x493   :  { %v1570_v40 = vmul.f32 %v1545_v17, %v3085_v63  ;;  %v1571_v28 = vmul.f32 %v1549_v4, %v3212_v47  ;;  %v1574_v50 = vmul.f32 %v1545_v17, %v3088_v60  ;;  %v1575_v31 = vmul.f32 %v1549_v4, %v3215_v10 }
 0x494   :  { %v1578_v32 = vmul.f32 %v1545_v17, %v3091_v12  ;;  %v1579_v53 = vmul.f32 %v1549_v4, %v3218_v57  ;;  %v1582_v37 = vmul.f32 %v1545_v17, %v3094_v38  ;;  %v1583_v61 = vmul.f32 %v1549_v4, %v3221_v27 }
 0x495   :  { %v1586_v29 = vmul.f32 %v1545_v17, %v3097_v2  ;;  %v1587_v16 = vmul.f32 %v1549_v4, %v3224_v0  ;;  %v1590_v63 = vmul.f32 %v1545_v17, %v3100_v59  ;;  %v1591_v47 = vmul.f32 %v1549_v4, %v3227_v1 }
 0x496   :  { %v1594_v60 = vmul.f32 %v1545_v17, %v3103_v14  ;;  %v1595_v10 = vmul.f32 %v1549_v4, %v3230_v34  ;;  %v1598_v12 = vmul.f32 %v1545_v17, %v4038_v11  ;;  %v1599_v57 = vmul.f32 %v1549_v4, %v3233_v5 }
 0x497   :  { %v1602_v38 = vmul.f32 %v1545_v17, %v4039_v36  ;;  %v1603_v27 = vmul.f32 %v1549_v4, %v3236_v62  ;;  %v1606_v2 = vmul.f32 %v1545_v17, %v4040_v8  ;;  %v1607_v0 = vmul.f32 %v1549_v4, %v3239_v3 }
 0x498   :  { %v1610_v59 = vmul.f32 %v1545_v17, %v4041_v6  ;;  %v1611_v1 = vmul.f32 %v1549_v4, %v3242_v58  ;;  %v1614_v14 = vmul.f32 %v1545_v17, %v4042_v56  ;;  %v1615_v34 = vmul.f32 %v1549_v4, %v3245_v26 }
 0x499   :  { %v1618_v11 = vmul.f32 %v1545_v17, %v4043_v46  ;;  %v1619_v5 = vmul.f32 %v1549_v4, %v3250_v9  ;;  %v1622_v36 = vmul.f32 %v1545_v17, %v4044_v18  ;;  %v1623_v62 = vmul.f32 %v1549_v4, %v3253_v45 }
 0x49a   :  { %v1647_v3 = vadd.f32 %v3424_v25, %v1562_v21  ;;  %v1648_v8 = vadd.f32 %v3429_v33, %v1563_v13  ;;  %v1651_v58 = vadd.f32 %v3424_v25, %v1566_v44  ;;  %v1652_v6 = vadd.f32 %v3429_v33, %v1567_v30 }
 0x49b   :  { %v1655_v26 = vadd.f32 %v3424_v25, %v1570_v40  ;;  %v1656_v56 = vadd.f32 %v3429_v33, %v1571_v28  ;;  %v1659_v9 = vadd.f32 %v3424_v25, %v1574_v50  ;;  %v1660_v18 = vadd.f32 %v3429_v33, %v1575_v31 }
 0x49c   :  { %v1663_v45 = vadd.f32 %v3424_v25, %v1578_v32  ;;  %v1664_v49 = vadd.f32 %v3429_v33, %v1579_v53  ;;  %v1667_v55 = vadd.f32 %v3424_v25, %v1582_v37  ;;  %1711 = vst [vmem:[#allocation10] sm:$0xff] %v1647_v3  ;;  %1712 = vst [vmem:[#allocation10 + $0x8] sm:$0xff] %v1648_v8  ;;  %v4049_v8 = vld [vmem:[#allocation59_spill] sm:$0xff] }
 0x49d   :  { %1713 = vst [vmem:[#allocation10 + $0x10] sm:$0xff] %v1651_v58  ;;  %v1668_v17 = vadd.f32 %v3429_v33, %v1583_v61  ;;  %v1671_v4 = vadd.f32 %v3424_v25, %v1586_v29  ;;  %v1672_v21 = vadd.f32 %v3429_v33, %v1587_v16  ;;  %v1675_v13 = vadd.f32 %v3424_v25, %v1590_v63 }
 0x49e   :  { %1714 = vst [vmem:[#allocation10 + $0x18] sm:$0xff] %v1652_v6  ;;  %1715 = vst [vmem:[#allocation10 + $0x20] sm:$0xff] %v1655_v26  ;;  %v1676_v44 = vadd.f32 %v3429_v33, %v1591_v47  ;;  %v1679_v30 = vadd.f32 %v3424_v25, %v1594_v60  ;;  %v1680_v40 = vadd.f32 %v3429_v33, %v1595_v10 }
 0x49f   :  { %1716 = vst [vmem:[#allocation10 + $0x28] sm:$0xff] %v1656_v56  ;;  %1717 = vst [vmem:[#allocation10 + $0x30] sm:$0xff] %v1659_v9  ;;  %v1683_v28 = vadd.f32 %v3424_v25, %v1598_v12  ;;  %v1684_v50 = vadd.f32 %v3429_v33, %v1599_v57  ;;  %v1687_v31 = vadd.f32 %v3424_v25, %v1602_v38  ;;  %v4045_v57 = vld [vmem:[#allocation56_spill] sm:$0xff]  ;;  %v4050_v56 = vld [vmem:[#allocation58_spill] sm:$0xff] }
 0x4a0   :  { %1718 = vst [vmem:[#allocation10 + $0x38] sm:$0xff] %v1660_v18  ;;  %1719 = vst [vmem:[#allocation10 + $0x40] sm:$0xff] %v1663_v45  ;;  %v1688_v32 = vadd.f32 %v3429_v33, %v1603_v27  ;;  %v1691_v53 = vadd.f32 %v3424_v25, %v1606_v2  ;;  %v1692_v37 = vadd.f32 %v3429_v33, %v1607_v0  ;;  %v4046_v2 = vld [vmem:[#allocation54_spill] sm:$0xff] }
 0x4a1   :  { %1720 = vst [vmem:[#allocation10 + $0x48] sm:$0xff] %v1664_v49  ;;  %1721 = vst [vmem:[#allocation10 + $0x50] sm:$0xff] %v1667_v55  ;;  %v1695_v61 = vadd.f32 %v3424_v25, %v1610_v59  ;;  %v1696_v29 = vadd.f32 %v3429_v33, %v1611_v1  ;;  %v1699_v16 = vadd.f32 %v3424_v25, %v1614_v14  ;;  %v4048_v14 = vld [vmem:[#allocation55_spill] sm:$0xff] }
 0x4a2   :  { %1722 = vst [vmem:[#allocation10 + $0x58] sm:$0xff] %v1668_v17  ;;  %1723 = vst [vmem:[#allocation10 + $0x60] sm:$0xff] %v1671_v4  ;;  %v1700_v63 = vadd.f32 %v3429_v33, %v1615_v34  ;;  %v1703_v47 = vadd.f32 %v3424_v25, %v1618_v11  ;;  %v1704_v60 = vadd.f32 %v3429_v33, %v1619_v5  ;;  %v4051_v4 = vld [vmem:[#allocation61_spill] sm:$0xff] }
 0x4a3   :  { %1724 = vst [vmem:[#allocation10 + $0x68] sm:$0xff] %v1672_v21  ;;  %1725 = vst [vmem:[#allocation10 + $0x70] sm:$0xff] %v1675_v13  ;;  %v1707_v10 = vadd.f32 %v3424_v25, %v1622_v36  ;;  %v1708_v12 = vadd.f32 %v3429_v33, %v1623_v62  ;;  %v1572_v38 = vmul.f32 %v3427_v22, %v4045_v57  ;;  %v4047_v33 = vld [vmem:[#allocation57_spill] sm:$0xff]  ;;  %v4055_v57 = vld [vmem:[#allocation64_spill] sm:$0xff] }
 0x4a4   :  { %1726 = vst [vmem:[#allocation10 + $0x78] sm:$0xff] %v1676_v44  ;;  %1727 = vst [vmem:[#allocation10 + $0x80] sm:$0xff] %v1679_v30  ;;  %v1573_v27 = vmul.f32 %v3467_v54, %v3295_v19  ;;  %v1564_v0 = vmul.f32 %v3427_v22, %v4046_v2  ;;  %v1565_v25 = vmul.f32 %v3467_v54, %v3287_v15  ;;  %v4052_v44 = vld [vmem:[#allocation60_spill] sm:$0xff] }
 0x4a5   :  { %1728 = vst [vmem:[#allocation10 + $0x88] sm:$0xff] %v1680_v40  ;;  %1729 = vst [vmem:[#allocation10 + $0x90] sm:$0xff] %v1683_v28  ;;  %v1576_v59 = vmul.f32 %v3427_v22, %v4047_v33  ;;  %v1577_v1 = vmul.f32 %v3467_v54, %v3299_v52  ;;  %v1568_v34 = vmul.f32 %v3427_v22, %v4048_v14  ;;  %v4053_v28 = vld [vmem:[#allocation63_spill] sm:$0xff]  ;;  %v4057_v14 = vld [vmem:[#allocation66_spill] sm:$0xff] }
 0x4a6   :  { %1730 = vst [vmem:[#allocation10 + $0x98] sm:$0xff] %v1684_v50  ;;  %1731 = vst [vmem:[#allocation10 + $0xa0] sm:$0xff] %v1687_v31  ;;  %v3516_v19 = vadd.f32 %v3431_v42, %v1572_v38  ;;  %v3519_v46 = vadd.f32 %v3433_v35, %v1573_v27  ;;  %v3522_v11 = vadd.f32 %v3431_v42, %v1564_v0  ;;  %v4056_v38 = vld [vmem:[#allocation25_spill] sm:$0xff] }
 0x4a7   :  { %1732 = vst [vmem:[#allocation10 + $0xa8] sm:$0xff] %v1688_v32  ;;  %1733 = vst [vmem:[#allocation10 + $0xb0] sm:$0xff] %v1691_v53  ;;  %v1569_v15 = vmul.f32 %v3467_v54, %v3291_v24  ;;  %v3527_v5 = vadd.f32 %v3433_v35, %v1565_v25  ;;  %v3530_v52 = vadd.f32 %v3431_v42, %v1576_v59 }
 0x4a8   :  { %1734 = vst [vmem:[#allocation10 + $0xb8] sm:$0xff] %v1692_v37  ;;  %1735 = vst [vmem:[#allocation10 + $0xc0] sm:$0xff] %v1695_v61  ;;  %v3533_v36 = vadd.f32 %v3433_v35, %v1577_v1  ;;  %v1749_v62 = vmax.f32 %v3516_v19, %v3519_v46  ;;  %v3538_v3 = vadd.f32 %v3431_v42, %v1568_v34 }
 0x4a9   :  { %1736 = vst [vmem:[#allocation10 + $0xc8] sm:$0xff] %v1696_v29  ;;  %1737 = vst [vmem:[#allocation10 + $0xd0] sm:$0xff] %v1699_v16  ;;  %v1584_v58 = vmul.f32 %v3427_v22, %v4049_v8  ;;  %v1585_v24 = vmul.f32 %v3467_v54, %v3307_v23  ;;  %v1743_v6 = vmax.f32 %v3522_v11, %v3527_v5  ;;  %v4054_v29 = vld [vmem:[#allocation62_spill] sm:$0xff] }
 0x4aa   :  { %1738 = vst [vmem:[#allocation10 + $0xd8] sm:$0xff] %v1700_v63  ;;  %1739 = vst [vmem:[#allocation10 + $0xe0] sm:$0xff] %v1703_v47  ;;  %v3547_v26 = vadd.f32 %v3433_v35, %v1569_v15  ;;  %v1580_v9 = vmul.f32 %v3427_v22, %v4050_v56  ;;  %v1581_v18 = vmul.f32 %v3467_v54, %v3303_v7  ;;  %1750 = vmax.xlane.f32.xlu1 %v1749_v62  ;;  %v4058_v15 = vld [vmem:[#allocation29_spill] sm:$0xff] }
 0x4ab   :  { %1740 = vst [vmem:[#allocation10 + $0xe8] sm:$0xff] %v1704_v60  ;;  %1741 = vst [vmem:[#allocation10 + $0xf0] sm:$0xff] %v1707_v10  ;;  %1744 = vmax.xlane.f32.xlu0 %v1743_v6  ;;  %v1752_v45 = vmax.f32 %v3530_v52, %v3533_v36  ;;  %v3556_v49 = vadd.f32 %v3431_v42, %v1584_v58  ;;  %v3559_v23 = vadd.f32 %v3433_v35, %v1585_v24  ;;  %v4059_v58 = vld [vmem:[#allocation65_spill] sm:$0xff]  ;;  %v4060_v6 = vld [vmem:[#allocation27_spill] sm:$0xff] }
 0x4ac   :  { %1742 = vst [vmem:[#allocation10 + $0xf8] sm:$0xff] %v1708_v12  ;;  %v3562_v55 = vadd.f32 %v3431_v42, %v1580_v9  ;;  %v3565_v17 = vadd.f32 %v3433_v35, %v1581_v18  ;;  %v1592_v7 = vmul.f32 %v3427_v22, %v4051_v4  ;;  %v1593_v21 = vmul.f32 %v3467_v54, %v3315_v48  ;;  %v4061_v9 = vld [vmem:[#allocation33_spill] sm:$0xff] }
 0x4ad   :  { %v1746_v13 = vmax.f32 %v3538_v3, %v3547_v26  ;;  %v1588_v30 = vmul.f32 %v3427_v22, %v4052_v44  ;;  %v1589_v40 = vmul.f32 %v3467_v54, %v3311_v20  ;;  %v1600_v50 = vmul.f32 %v3427_v22, %v4053_v28  ;;  %v4063_v28 = vld [vmem:[#allocation67_spill] sm:$0xff] }
 0x4ae   :  { %1753 = vmax.xlane.f32.xlu1 %v1752_v45  ;;  %v1601_v31 = vmul.f32 %v3467_v54, %v3323_v39  ;;  %v1758_v48 = vmax.f32 %v3556_v49, %v3559_v23  ;;  %v1755_v32 = vmax.f32 %v3562_v55, %v3565_v17  ;;  %v3586_v53 = vadd.f32 %v3431_v42, %v1592_v7 }
 0x4af   :  { %1747 = vmax.xlane.f32.xlu0 %v1746_v13  ;;  %v3589_v37 = vadd.f32 %v3433_v35, %v1593_v21  ;;  %v3592_v20 = vadd.f32 %v3431_v42, %v1588_v30  ;;  %v3595_v61 = vadd.f32 %v3433_v35, %v1589_v40  ;;  %v1596_v39 = vmul.f32 %v3427_v22, %v4054_v29  ;;  %v4062_v13 = vld [vmem:[#allocation68_spill] sm:$0xff] }
 0x4b0   :  { %v1597_v16 = vmul.f32 %v3467_v54, %v3319_v43  ;;  %v3602_v63 = vadd.f32 %v3431_v42, %v1600_v50  ;;  %v3605_v47 = vadd.f32 %v3433_v35, %v1601_v31  ;;  %v1608_v60 = vmul.f32 %v3427_v22, %v3165_v41  ;;  %v4064_v31 = vld [vmem:[#allocation31_spill] sm:$0xff] }
 0x4b1   :  { %v1609_v10 = vmul.f32 %v3467_v54, %v3331_v51  ;;  %v1764_v12 = vmax.f32 %v3586_v53, %v3589_v37  ;;  %v1604_v43 = vmul.f32 %v3427_v22, %v4055_v57  ;;  %v1605_v27 = vmul.f32 %v3467_v54, %v4056_v38 }
 0x4b2   :  { %1759 = vmax.xlane.f32.xlu1 %v1758_v48  ;;  %v1761_v2 = vmax.f32 %v3592_v20, %v3595_v61  ;;  %v3620_v0 = vadd.f32 %v3431_v42, %v1596_v39  ;;  %v3623_v41 = vadd.f32 %v3433_v35, %v1597_v16  ;;  %v1770_v51 = vmax.f32 %v3602_v63, %v3605_v47 }
 0x4b3   :  { %1756 = vmax.xlane.f32.xlu0 %v1755_v32  ;;  %v3628_v25 = vadd.f32 %v3431_v42, %v1608_v60  ;;  %v3631_v33 = vadd.f32 %v3433_v35, %v1609_v10  ;;  %v3634_v59 = vadd.f32 %v3431_v42, %v1604_v43  ;;  %v3637_v1 = vadd.f32 %v3433_v35, %v1605_v27 }
 0x4b4   :  { %v1616_v34 = vmul.f32 %v3427_v22, %v4057_v14  ;;  %v1617_v62 = vmul.f32 %v3467_v54, %v4058_v15  ;;  %v1767_v8 = vmax.f32 %v3620_v0, %v3623_v41  ;;  %v1612_v24 = vmul.f32 %v3427_v22, %v4059_v58 }
 0x4b5   :  { %v1613_v56 = vmul.f32 %v3467_v54, %v4060_v6  ;;  %v1625_v18 = vmul.f32 %v3467_v54, %v4061_v9  ;;  %v1776_v45 = vmax.f32 %v3628_v25, %v3631_v33  ;;  %v1773_v4 = vmax.f32 %v3634_v59, %v3637_v1 }
 0x4b6   :  { %1765 = vmax.xlane.f32.xlu1 %v1764_v12  ;;  %v3656_v7 = vadd.f32 %v3431_v42, %v1616_v34  ;;  %v3659_v21 = vadd.f32 %v3433_v35, %v1617_v62  ;;  %v1624_v44 = vmul.f32 %v3427_v22, %v4062_v13  ;;  %v3664_v30 = vadd.f32 %v3431_v42, %v1612_v24 }
 0x4b7   :  { %1762 = vmax.xlane.f32.xlu0 %v1761_v2  ;;  %v3667_v40 = vadd.f32 %v3433_v35, %v1613_v56  ;;  %v1620_v50 = vmul.f32 %v3427_v22, %v4063_v28  ;;  %v1621_v48 = vmul.f32 %v3467_v54, %v4064_v31  ;;  %v3679_v39 = vadd.f32 %v3433_v35, %v1625_v18 }
 0x4b8   :  { %v1782_v32 = vmax.f32 %v3656_v7, %v3659_v21  ;;  %v3676_v29 = vadd.f32 %v3431_v42, %v1624_v44 }
 0x4b9   :  { %v1779_v16 = vmax.f32 %v3664_v30, %v3667_v40  ;;  %v3684_v60 = vadd.f32 %v3431_v42, %v1620_v50  ;;  %v3687_v22 = vadd.f32 %v3433_v35, %v1621_v48 }
 0x4ba   :  { %1771 = vmax.xlane.f32.xlu1 %v1770_v51  ;;  %v1788_v54 = vmax.f32 %v3676_v29, %v3679_v39 }
 0x4bb   :  { %1768 = vmax.xlane.f32.xlu0 %v1767_v8  ;;  %v1785_v10 = vmax.f32 %v3684_v60, %v3687_v22 }
 0x4be   :  { %1777 = vmax.xlane.f32.xlu1 %v1776_v45 }
 0x4bf   :  { %1774 = vmax.xlane.f32.xlu0 %v1773_v4 }
 0x4c2   :  { %1783 = vmax.xlane.f32.xlu1 %v1782_v32 }
 0x4c3   :  { %1780 = vmax.xlane.f32.xlu0 %v1779_v16 }
 0x4c6   :  { %1789 = vmax.xlane.f32.xlu1 %v1788_v54 }
 0x4c7   :  { %1786 = vmax.xlane.f32.xlu0 %v1785_v10 }
 0x537   :  { %v1751_v12 = vpop.xlane.xlu1 %1750 }
 0x538   :  { %v1795_v57 = vsub.f32 %v3516_v19, %v1751_v12  ;;  %v1796_v43 = vsub.f32 %v3519_v46, %v1751_v12  ;;  %v1745_v42 = vpop.xlane.xlu0 %1744 }
 0x539   :  { %v1791_v38 = vsub.f32 %v3522_v11, %v1745_v42  ;;  %v1792_v35 = vsub.f32 %v3527_v5, %v1745_v42 }
 0x53a   :  { %v1831_v27 = vmul.f32 1.442695, %v1795_v57  ;;  %v1833_v34 = vmul.f32 1.442695, %v1796_v43 }
 0x53b   :  { %v1823_v2 = vmul.f32 1.442695, %v1791_v38  ;;  %v1825_v51 = vmul.f32 1.442695, %v1792_v35  ;;  %v1754_v14 = vpop.xlane.xlu1 %1753 }
 0x53c   :  { %v1797_v15 = vsub.f32 %v3530_v52, %v1754_v14  ;;  %v1798_v62 = vsub.f32 %v3533_v36, %v1754_v14  ;;  %v1748_v8 = vpop.xlane.xlu0 %1747  ;;  %2300 = vpow2.f32 %v1831_v27 }
 0x53d   :  { %v1793_v19 = vsub.f32 %v3538_v3, %v1748_v8  ;;  %v1794_v46 = vsub.f32 %v3547_v26, %v1748_v8  ;;  %2302 = vpow2.f32 %v1823_v2 }
 0x53e   :  { %v1835_v58 = vmul.f32 1.442695, %v1797_v15  ;;  %2304 = vpow2.f32 %v1825_v51  ;;  %v1837_v6 = vmul.f32 1.442695, %v1798_v62 }
 0x53f   :  { %v1827_v11 = vmul.f32 1.442695, %v1793_v19  ;;  %v1829_v5 = vmul.f32 1.442695, %v1794_v46  ;;  %v1760_v24 = vpop.xlane.xlu1 %1759  ;;  %2306 = vpow2.f32 %v1833_v34 }
 0x540   :  { %v1801_v56 = vsub.f32 %v3556_v49, %v1760_v24  ;;  %v1802_v52 = vsub.f32 %v3559_v23, %v1760_v24  ;;  %v1757_v9 = vpop.xlane.xlu0 %1756  ;;  %2308 = vpow2.f32 %v1835_v58 }
 0x541   :  { %v1799_v36 = vsub.f32 %v3562_v55, %v1757_v9  ;;  %v1800_v3 = vsub.f32 %v3565_v17, %v1757_v9  ;;  %2310 = vpow2.f32 %v1827_v11 }
 0x542   :  { %v1843_v26 = vmul.f32 1.442695, %v1801_v56  ;;  %2312 = vpow2.f32 %v1829_v5  ;;  %v1845_v13 = vmul.f32 1.442695, %v1802_v52 }
 0x543   :  { %v1839_v18 = vmul.f32 1.442695, %v1799_v36  ;;  %v1841_v45 = vmul.f32 1.442695, %v1800_v3  ;;  %v1766_v4 = vpop.xlane.xlu1 %1765  ;;  %2314 = vpow2.f32 %v1837_v6 }
 0x544   :  { %v1805_v44 = vsub.f32 %v3586_v53, %v1766_v4  ;;  %v1806_v49 = vsub.f32 %v3589_v37, %v1766_v4  ;;  %v1763_v28 = vpop.xlane.xlu0 %1762  ;;  %2316 = vpow2.f32 %v1843_v26 }
 0x545   :  { %v1803_v23 = vsub.f32 %v3592_v20, %v1763_v28  ;;  %v1804_v55 = vsub.f32 %v3595_v61, %v1763_v28  ;;  %2318 = vpow2.f32 %v1839_v18 }
 0x546   :  { %v1851_v17 = vmul.f32 1.442695, %v1805_v44  ;;  %v3709_v50 = vpop.eup %2300  ;;  %2320 = vpow2.f32 %v1841_v45  ;;  %v1853_v53 = vmul.f32 1.442695, %v1806_v49 }
 0x547   :  { %v1847_v31 = vmul.f32 1.442695, %v1803_v23  ;;  %v1849_v48 = vmul.f32 1.442695, %v1804_v55  ;;  %v1772_v32 = vpop.xlane.xlu1 %1771  ;;  %v3711_v16 = vpop.eup %2302  ;;  %2322 = vpow2.f32 %v1845_v13 }
 0x548   :  { %v1809_v37 = vsub.f32 %v3602_v63, %v1772_v32  ;;  %v1810_v54 = vsub.f32 %v3605_v47, %v1772_v32  ;;  %v1769_v10 = vpop.xlane.xlu0 %1768  ;;  %v3715_v20 = vpop.eup %2304  ;;  %2324 = vpow2.f32 %v1851_v17 }
 0x549   :  { %v1807_v61 = vsub.f32 %v3620_v0, %v1769_v10  ;;  %v1808_v12 = vsub.f32 %v3623_v41, %v1769_v10  ;;  %v3719_v57 = vpop.eup %2306  ;;  %2326 = vpow2.f32 %v1847_v31  ;;  %v1887_v42 = vadd.f32 %v3715_v20, %v3711_v16 }
 0x54a   :  { %v1859_v43 = vmul.f32 1.442695, %v1809_v37  ;;  %v3723_v38 = vpop.eup %2308  ;;  %2328 = vpow2.f32 %v1849_v48  ;;  %v1861_v2 = vmul.f32 1.442695, %v1810_v54  ;;  %v1893_v19 = vadd.f32 %v3719_v57, %v3709_v50 }
 0x54b   :  { %v1855_v63 = vmul.f32 1.442695, %v1807_v61  ;;  %v1857_v47 = vmul.f32 1.442695, %v1808_v12  ;;  %v1778_v35 = vpop.xlane.xlu1 %1777  ;;  %v3725_v27 = vpop.eup %2310  ;;  %2330 = vpow2.f32 %v1853_v53  ;;  %1888 = vadd.xlane.f32.xlu0 %v1887_v42 }
 0x54c   :  { %v1813_v0 = vsub.f32 %v3628_v25, %v1778_v35  ;;  %v1814_v41 = vsub.f32 %v3631_v33, %v1778_v35  ;;  %v1775_v51 = vpop.xlane.xlu0 %1774  ;;  %v3729_v14 = vpop.eup %2312  ;;  %2332 = vpow2.f32 %v1859_v43 }
 0x54d   :  { %v1811_v34 = vsub.f32 %v3634_v59, %v1775_v51  ;;  %v1812_v15 = vsub.f32 %v3637_v1, %v1775_v51  ;;  %v3733_v62 = vpop.eup %2314  ;;  %2334 = vpow2.f32 %v1855_v63  ;;  %v1890_v25 = vadd.f32 %v3729_v14, %v3725_v27 }
 0x54e   :  { %v1867_v8 = vmul.f32 1.442695, %v1813_v0  ;;  %v3739_v46 = vpop.eup %2316  ;;  %2336 = vpow2.f32 %v1857_v47  ;;  %v1869_v59 = vmul.f32 1.442695, %v1814_v41  ;;  %v1896_v3 = vadd.f32 %v3733_v62, %v3723_v38 }
 0x54f   :  { %v1863_v33 = vmul.f32 1.442695, %v1811_v34  ;;  %v1865_v58 = vmul.f32 1.442695, %v1812_v15  ;;  %v1784_v11 = vpop.xlane.xlu1 %1783  ;;  %v3741_v5 = vpop.eup %2318  ;;  %2338 = vpow2.f32 %v1861_v2  ;;  %1894 = vadd.xlane.f32.xlu0 %v1893_v19  ;;  %1891 = vadd.xlane.f32.xlu1 %v1890_v25 }
 0x550   :  { %v1817_v1 = vsub.f32 %v3656_v7, %v1784_v11  ;;  %v1781_v24 = vpop.xlane.xlu0 %1780  ;;  %v3744_v6 = vpop.eup %2320  ;;  %2340 = vpow2.f32 %v1867_v8  ;;  %v1818_v56 = vsub.f32 %v3659_v21, %v1784_v11 }
 0x551   :  { %v1815_v52 = vsub.f32 %v3664_v30, %v1781_v24  ;;  %v1816_v9 = vsub.f32 %v3667_v40, %v1781_v24  ;;  %v3749_v36 = vpop.eup %2322  ;;  %2342 = vpow2.f32 %v1863_v33  ;;  %v1899_v26 = vadd.f32 %v3744_v6, %v3741_v5 }
 0x552   :  { %v3755_v7 = vpop.eup %2324  ;;  %2344 = vpow2.f32 %v1865_v58  ;;  %v1875_v30 = vmul.f32 1.442695, %v1817_v1  ;;  %v1877_v49 = vmul.f32 1.442695, %v1818_v56  ;;  %v1902_v31 = vadd.f32 %v3749_v36, %v3739_v46 }
 0x553   :  { %v1871_v18 = vmul.f32 1.442695, %v1815_v52  ;;  %v1873_v45 = vmul.f32 1.442695, %v1816_v9  ;;  %v1790_v4 = vpop.xlane.xlu1 %1789  ;;  %v3757_v21 = vpop.eup %2326  ;;  %2346 = vpow2.f32 %v1869_v59  ;;  %1897 = vadd.xlane.f32.xlu1 %v1896_v3  ;;  %1900 = vadd.xlane.f32.xlu0 %v1899_v26 }
 0x554   :  { %v1821_v40 = vsub.f32 %v3676_v29, %v1790_v4  ;;  %v1787_v13 = vpop.xlane.xlu0 %1786  ;;  %v3760_v44 = vpop.eup %2328  ;;  %v1822_v28 = vsub.f32 %v3679_v39, %v1790_v4 }
 0x555   :  { %v1819_v23 = vsub.f32 %v3684_v60, %v1787_v13  ;;  %v1820_v55 = vsub.f32 %v3687_v22, %v1787_v13  ;;  %v3765_v17 = vpop.eup %2330  ;;  %2348 = vpow2.f32 %v1871_v18  ;;  %v1905_v48 = vadd.f32 %v3760_v44, %v3757_v21 }
 0x556   :  { %v3771_v29 = vpop.eup %2332  ;;  %2350 = vpow2.f32 %v1873_v45  ;;  %v1883_v39 = vmul.f32 1.442695, %v1821_v40  ;;  %v1885_v22 = vmul.f32 1.442695, %v1822_v28  ;;  %v1908_v10 = vadd.f32 %v3765_v17, %v3755_v7 }
 0x557   :  { %v1879_v32 = vmul.f32 1.442695, %v1819_v23  ;;  %v1881_v53 = vmul.f32 1.442695, %v1820_v55  ;;  %v3773_v37 = vpop.eup %2334  ;;  %2352 = vpow2.f32 %v1875_v30  ;;  %1903 = vadd.xlane.f32.xlu1 %v1902_v31  ;;  %1906 = vadd.xlane.f32.xlu0 %v1905_v48 }
 0x558   :  { %v3775_v60 = vpop.eup %2336  ;;  %2354 = vpow2.f32 %v1877_v49 }
 0x559   :  { %v3777_v54 = vpop.eup %2338  ;;  %2356 = vpow2.f32 %v1879_v32  ;;  %v1911_v61 = vadd.f32 %v3775_v60, %v3773_v37 }
 0x55a   :  { %v3783_v12 = vpop.eup %2340  ;;  %2358 = vpow2.f32 %v1881_v53  ;;  %v1914_v47 = vadd.f32 %v3777_v54, %v3771_v29 }
 0x55b   :  { %v3785_v43 = vpop.eup %2342  ;;  %2360 = vpow2.f32 %v1883_v39  ;;  %1909 = vadd.xlane.f32.xlu1 %v1908_v10  ;;  %1912 = vadd.xlane.f32.xlu0 %v1911_v61 }
 0x55c   :  { %v3787_v42 = vpop.eup %2344  ;;  %2362 = vpow2.f32 %v1885_v22 }
 0x55d   :  { %v3789_v63 = vpop.eup %2346  ;;  %v1917_v35 = vadd.f32 %v3787_v42, %v3785_v43 }
 0x55e   :  { %v1920_v51 = vadd.f32 %v3789_v63, %v3783_v12 }
 0x55f   :  { %v3795_v2 = vpop.eup %2348  ;;  %1915 = vadd.xlane.f32.xlu1 %v1914_v47  ;;  %1918 = vadd.xlane.f32.xlu0 %v1917_v35 }
 0x560   :  { %v3797_v0 = vpop.eup %2350 }
 0x561   :  { %v3799_v41 = vpop.eup %2352  ;;  %v1923_v34 = vadd.f32 %v3797_v0, %v3795_v2 }
 0x562   :  { %v3805_v15 = vpop.eup %2354 }
 0x563   :  { %v3807_v8 = vpop.eup %2356  ;;  %1921 = vadd.xlane.f32.xlu1 %v1920_v51  ;;  %1924 = vadd.xlane.f32.xlu0 %v1923_v34  ;;  %v1926_v33 = vadd.f32 %v3805_v15, %v3799_v41 }
 0x564   :  { %v3809_v19 = vpop.eup %2358 }
 0x565   :  { %v3811_v25 = vpop.eup %2360  ;;  %v1929_v58 = vadd.f32 %v3809_v19, %v3807_v8 }
 0x566   :  { %v3817_v11 = vpop.eup %2362 }
 0x567   :  { %1927 = vadd.xlane.f32.xlu1 %v1926_v33  ;;  %1930 = vadd.xlane.f32.xlu0 %v1929_v58  ;;  %v1932_v59 = vadd.f32 %v3817_v11, %v3811_v25 }
 0x56b   :  { %1933 = vadd.xlane.f32.xlu1 %v1932_v59 }
 0x56c   :  { %2495 = shalt.err (!%p2492_p8)
}
 0x56d   :  { %s2496_s21 = scalar_lea.hbm %s3893_s10, 4096 }
 0x56e   :  { %p2497_p9 = scmp.ne.s32.totalorder %s3893_s10, %s2496_s21  ;;  %p2500_p10 = scmp.lt.u32.totalorder %s2496_s21, %s3893_s10 }
 0x570   :  { %p2502_p11 = pnand %p2500_p10, %p2497_p9 }
 0x572   :  { %2505 = shalt.err (!%p2502_p11)
}
 0x573   :  { %2026 = dma.vmem_to_hbm [thread:$0]  %s2021_s9, 4096, %s3893_s10, [#allocation4], %s2544_s4, %s2544_s4, %s2545_s29  }
 0x574   :  { %s2549_s10 = smov [#allocation11]  }
 0x575   :  { %s2032_s28 = sshll.u32 %s2549_s10, 4  ;;  %s2033_s28 = int_to_ptr.vmem [resolvable:$true] %s2032_s28 }
 0x576   :  { %s2506_s30 = scalar_lea.vmem %s2033_s28, 4096  ;;  %p2511_p13 = scmp.lt.s32.totalorder %s2033_s28, %s2033_s28 }
 0x577   :  { %p2507_p12 = scmp.ne.s32.totalorder %s2033_s28, %s2506_s30  ;;  %p2512_p0 = scmp.lt.s32.totalorder %s2506_s30, %s2506_s30 }
 0x579   :  { %p2513_p1 = por %p2512_p0, %p2511_p13 }
 0x57b   :  { %p2514_p2 = pnand %p2513_p1, %p2507_p12 }
 0x5d8   :  { %v1889_v1 = vpop.xlane.xlu0 %1888 }
 0x5d9   :  { %2364 = vrcp.f32 %v1889_v1 }
 0x5dc   :  { %v1892_v24 = vpop.xlane.xlu1 %1891  ;;  %v1895_v56 = vpop.xlane.xlu0 %1894 }
 0x5dd   :  { %2366 = vrcp.f32 %v1892_v24 }
 0x5de   :  { %2368 = vrcp.f32 %v1895_v56 }
 0x5e0   :  { %v1898_v52 = vpop.xlane.xlu1 %1897  ;;  %v1901_v9 = vpop.xlane.xlu0 %1900 }
 0x5e1   :  { %2370 = vrcp.f32 %v1898_v52 }
 0x5e2   :  { %2372 = vrcp.f32 %v1901_v9 }
 0x5e3   :  { %v2365_v3 = vpop.eup %2364 }
 0x5e4   :  { %v1936_v26 = vmul.f32 %v2365_v3, %v3711_v16  ;;  %v1937_v18 = vmul.f32 %v2365_v3, %v3715_v20  ;;  %v1904_v45 = vpop.xlane.xlu1 %1903  ;;  %v1907_v4 = vpop.xlane.xlu0 %1906 }
 0x5e5   :  { %2374 = vrcp.f32 %v1904_v45 }
 0x5e6   :  { %1983 = vst [vmem:[#allocation11] sm:$0xff] %v1936_v26  ;;  %1984 = vst [vmem:[#allocation11 + $0x8] sm:$0xff] %v1937_v18  ;;  %2376 = vrcp.f32 %v1907_v4 }
 0x5e7   :  { %v2367_v30 = vpop.eup %2366 }
 0x5e8   :  { %v2369_v40 = vpop.eup %2368  ;;  %v1939_v13 = vmul.f32 %v2367_v30, %v3725_v27  ;;  %v1940_v49 = vmul.f32 %v2367_v30, %v3729_v14  ;;  %v1910_v28 = vpop.xlane.xlu1 %1909 }
 0x5e9   :  { %v1913_v23 = vpop.xlane.xlu0 %1912  ;;  %v1942_v55 = vmul.f32 %v2369_v40, %v3709_v50  ;;  %v1943_v16 = vmul.f32 %v2369_v40, %v3719_v57  ;;  %2378 = vrcp.f32 %v1910_v28 }
 0x5ea   :  { %1985 = vst [vmem:[#allocation11 + $0x10] sm:$0xff] %v1939_v13  ;;  %1986 = vst [vmem:[#allocation11 + $0x18] sm:$0xff] %v1940_v49  ;;  %2380 = vrcp.f32 %v1913_v23 }
 0x5eb   :  { %v2371_v20 = vpop.eup %2370  ;;  %1987 = vst [vmem:[#allocation11 + $0x20] sm:$0xff] %v1942_v55  ;;  %1988 = vst [vmem:[#allocation11 + $0x28] sm:$0xff] %v1943_v16 }
 0x5ec   :  { %v2373_v31 = vpop.eup %2372  ;;  %v1945_v48 = vmul.f32 %v2371_v20, %v3723_v38  ;;  %v1946_v27 = vmul.f32 %v2371_v20, %v3733_v62  ;;  %v1916_v32 = vpop.xlane.xlu1 %1915 }
 0x5ed   :  { %v1919_v14 = vpop.xlane.xlu0 %1918  ;;  %v1948_v53 = vmul.f32 %v2373_v31, %v3741_v5  ;;  %v1949_v50 = vmul.f32 %v2373_v31, %v3744_v6  ;;  %2382 = vrcp.f32 %v1916_v32 }
 0x5ee   :  { %1989 = vst [vmem:[#allocation11 + $0x30] sm:$0xff] %v1945_v48  ;;  %1990 = vst [vmem:[#allocation11 + $0x38] sm:$0xff] %v1946_v27  ;;  %2384 = vrcp.f32 %v1919_v14 }
 0x5ef   :  { %v2375_v57 = vpop.eup %2374  ;;  %1991 = vst [vmem:[#allocation11 + $0x40] sm:$0xff] %v1948_v53  ;;  %1992 = vst [vmem:[#allocation11 + $0x48] sm:$0xff] %v1949_v50 }
 0x5f0   :  { %v2377_v39 = vpop.eup %2376  ;;  %v1951_v22 = vmul.f32 %v2375_v57, %v3739_v46  ;;  %v1952_v38 = vmul.f32 %v2375_v57, %v3749_v36  ;;  %v1922_v10 = vpop.xlane.xlu1 %1921 }
 0x5f1   :  { %v1925_v62 = vpop.xlane.xlu0 %1924  ;;  %v1954_v61 = vmul.f32 %v2377_v39, %v3757_v21  ;;  %v1955_v5 = vmul.f32 %v2377_v39, %v3760_v44  ;;  %2386 = vrcp.f32 %v1922_v10 }
 0x5f2   :  { %1993 = vst [vmem:[#allocation11 + $0x50] sm:$0xff] %v1951_v22  ;;  %1994 = vst [vmem:[#allocation11 + $0x58] sm:$0xff] %v1952_v38  ;;  %2388 = vrcp.f32 %v1925_v62 }
 0x5f3   :  { %v2379_v6 = vpop.eup %2378  ;;  %1995 = vst [vmem:[#allocation11 + $0x60] sm:$0xff] %v1954_v61  ;;  %1996 = vst [vmem:[#allocation11 + $0x68] sm:$0xff] %v1955_v5 }
 0x5f4   :  { %v2381_v47 = vpop.eup %2380  ;;  %v1957_v35 = vmul.f32 %v2379_v6, %v3755_v7  ;;  %v1958_v46 = vmul.f32 %v2379_v6, %v3765_v17  ;;  %v1928_v51 = vpop.xlane.xlu1 %1927 }
 0x5f5   :  { %v1931_v36 = vpop.xlane.xlu0 %1930  ;;  %v1960_v34 = vmul.f32 %v2381_v47, %v3773_v37  ;;  %v1961_v21 = vmul.f32 %v2381_v47, %v3775_v60  ;;  %2390 = vrcp.f32 %v1928_v51 }
 0x5f6   :  { %1997 = vst [vmem:[#allocation11 + $0x70] sm:$0xff] %v1957_v35  ;;  %1998 = vst [vmem:[#allocation11 + $0x78] sm:$0xff] %v1958_v46  ;;  %2392 = vrcp.f32 %v1931_v36 }
 0x5f7   :  { %v2383_v44 = vpop.eup %2382  ;;  %1999 = vst [vmem:[#allocation11 + $0x80] sm:$0xff] %v1960_v34  ;;  %2000 = vst [vmem:[#allocation11 + $0x88] sm:$0xff] %v1961_v21 }
 0x5f8   :  { %v2385_v33 = vpop.eup %2384  ;;  %v1963_v58 = vmul.f32 %v2383_v44, %v3771_v29  ;;  %v1964_v7 = vmul.f32 %v2383_v44, %v3777_v54  ;;  %v1934_v59 = vpop.xlane.xlu1 %1933 }
 0x5f9   :  { %v1966_v17 = vmul.f32 %v2385_v33, %v3785_v43  ;;  %v1967_v1 = vmul.f32 %v2385_v33, %v3787_v42  ;;  %2394 = vrcp.f32 %v1934_v59 }
 0x5fa   :  { %2001 = vst [vmem:[#allocation11 + $0x90] sm:$0xff] %v1963_v58  ;;  %2002 = vst [vmem:[#allocation11 + $0x98] sm:$0xff] %v1964_v7 }
 0x5fb   :  { %v2387_v37 = vpop.eup %2386  ;;  %2003 = vst [vmem:[#allocation11 + $0xa0] sm:$0xff] %v1966_v17  ;;  %2004 = vst [vmem:[#allocation11 + $0xa8] sm:$0xff] %v1967_v1 }
 0x5fc   :  { %v2389_v60 = vpop.eup %2388  ;;  %v1969_v24 = vmul.f32 %v2387_v37, %v3783_v12  ;;  %v1970_v56 = vmul.f32 %v2387_v37, %v3789_v63 }
 0x5fd   :  { %v1972_v29 = vmul.f32 %v2389_v60, %v3795_v2  ;;  %v1973_v54 = vmul.f32 %v2389_v60, %v3797_v0 }
 0x5fe   :  { %2005 = vst [vmem:[#allocation11 + $0xb0] sm:$0xff] %v1969_v24  ;;  %2006 = vst [vmem:[#allocation11 + $0xb8] sm:$0xff] %v1970_v56 }
 0x5ff   :  { %v2391_v43 = vpop.eup %2390  ;;  %2007 = vst [vmem:[#allocation11 + $0xc0] sm:$0xff] %v1972_v29  ;;  %2008 = vst [vmem:[#allocation11 + $0xc8] sm:$0xff] %v1973_v54 }
 0x600   :  { %v2393_v42 = vpop.eup %2392  ;;  %v1975_v52 = vmul.f32 %v2391_v43, %v3799_v41  ;;  %v1976_v9 = vmul.f32 %v2391_v43, %v3805_v15 }
 0x601   :  { %v1978_v3 = vmul.f32 %v2393_v42, %v3807_v8  ;;  %v1979_v12 = vmul.f32 %v2393_v42, %v3809_v19 }
 0x602   :  { %2009 = vst [vmem:[#allocation11 + $0xd0] sm:$0xff] %v1975_v52  ;;  %2010 = vst [vmem:[#allocation11 + $0xd8] sm:$0xff] %v1976_v9 }
 0x603   :  { %v2395_v63 = vpop.eup %2394  ;;  %2011 = vst [vmem:[#allocation11 + $0xe0] sm:$0xff] %v1978_v3  ;;  %2012 = vst [vmem:[#allocation11 + $0xe8] sm:$0xff] %v1979_v12 }
 0x604   :  { %v1981_v2 = vmul.f32 %v2395_v63, %v3811_v25  ;;  %v1982_v0 = vmul.f32 %v2395_v63, %v3817_v11 }
 0x606   :  { %2013 = vst [vmem:[#allocation11 + $0xf0] sm:$0xff] %v1981_v2  ;;  %2014 = vst [vmem:[#allocation11 + $0xf8] sm:$0xff] %v1982_v0 }
 0x607   :  { %2517 = shalt.err (!%p2514_p2)
}
 0x608   :  { %s2518_s27 = scalar_lea.hbm %s3894_s11, 4096 }
 0x609   :  { %p2519_p3 = scmp.ne.s32.totalorder %s3894_s11, %s2518_s27  ;;  %p2522_p4 = scmp.lt.u32.totalorder %s2518_s27, %s3894_s11 }
 0x60b   :  { %p2524_p5 = pnand %p2522_p4, %p2519_p3 }
 0x60d   :  { %2527 = shalt.err (!%p2524_p5)
}
 0x60e   :  { %2038 = dma.vmem_to_hbm [thread:$0]  %s2033_s28, 4096, %s3894_s11, [#allocation12], %s2544_s4, %s2544_s4, %s2545_s29  }
 0x60f   :  { %2534 = dma.done.wait [#allocation4], 4096  }
 0x610   :  { %2535 = vsyncadd [#allocation4], 4294963200 }
 0x611   :  { %2536 = dma.done.wait [#allocation12], 4096  }
 0x612   :  { %2537 = vsyncadd [#allocation12], 4294963200 }
 0x613   :  { %2045 = vsyncpa [#allocation3], 1 }
 0x614   :  { %2046 = vsyncpa [#allocation6], 1 }
 0x615   :  { %2047 = vsyncpa [#allocation9], 1 }
 0x616   :  { %2048 = vsyncpa [#allocation4], 1 }
 0x617   :  { %2049 = vsyncpa [#allocation12], 1 }

</bundles_post_ra>
